<compile_context>
chip_gen: v7x
topology: tpu7x:2x2x1
jax: 0.10.0
libtpu: 0.0.40
codegen_flags: <defaults>
</compile_context>

<pallas_src>
import jax
import jax.numpy as jnp
import numpy as np
from jax.experimental import pallas as pl
from jax.experimental.pallas import tpu as pltpu

EPS = 1e-5


# ----------------------------------------------------------------------------
# Weight preparation: 3x3 conv as 3 banded (row-Toeplitz) matrices.
#   out[h, w*Cout+co] = sum_dh  x_pad_row[h+dh, :] @ B[dh]
# where x_pad rows are the lane-flattened ((W+2)*Cin) padded image rows.
# ----------------------------------------------------------------------------
def conv3x3_banded_weights(w_oihw, W):
    """PyTorch (Cout, Cin, 3, 3) -> (3, (W+2)*Cin, W*Cout) banded matrices."""
    co, ci, kh, kw = w_oihw.shape
    assert kh == 3 and kw == 3
    w_taps = jnp.transpose(w_oihw.astype(jnp.float32), (2, 3, 1, 0))  # (3,3,ci,co)
    bands = []
    for dh in range(3):
        b = jnp.zeros(((W + 2) * ci, W * co), jnp.float32)
        for dw in range(3):
            shift_eye = jnp.eye(W + 2, W, k=-dw, dtype=jnp.float32)   # row = col+dw
            b = b + jnp.kron(shift_eye, w_taps[dh, dw])
        bands.append(b)
    return jnp.stack(bands, axis=0)


# ----------------------------------------------------------------------------
# Kernel 1: fused 3x3 conv (3 banded matmuls) + per-image BN partial stats.
#   xp_ref : (1, H+2, (W+2)*Cin)   lane-flattened padded image
#   wb_ref : (3, (W+2)*Cin, W*Cout)
#   z_ref  : (H, W*Cout)           pre-BN conv output (lane dense)
#   st_ref : (1, 2, W*Cout)        [sum, sum of squares] over the H rows
# ----------------------------------------------------------------------------
def conv3x3_stats_kernel(xp_ref, wb_ref, z_ref, st_ref):
    H = z_ref.shape[0]
    xp = xp_ref[0]                                       # (H+2, (W+2)*Cin)
    acc = jnp.zeros(z_ref.shape, jnp.float32)            # (H, W*Cout)
    for dh in range(3):                                  # unrolled at trace time
        acc = acc + jnp.dot(xp[dh:dh + H, :], wb_ref[dh],
                            preferred_element_type=jnp.float32)
    z_ref[...] = acc
    st_ref[0] = jnp.concatenate(
        [jnp.sum(acc, axis=0, keepdims=True),
         jnp.sum(acc * acc, axis=0, keepdims=True)], axis=0)


def conv3x3_with_stats(xp2, wb, H, W, Cout):
    N, Hp2, Kp = xp2.shape
    L = W * Cout
    return pl.pallas_call(
        conv3x3_stats_kernel,
        out_shape=(jax.ShapeDtypeStruct((N * H, L), jnp.float32),
                   jax.ShapeDtypeStruct((N, 2, L), jnp.float32)),
        grid=(N,),
        in_specs=[pl.BlockSpec((1, Hp2, Kp), lambda n: (n, 0, 0)),
                  pl.BlockSpec(wb.shape, lambda n: (0, 0, 0))],
        out_specs=(pl.BlockSpec((H, L), lambda n: (n, 0)),
                   pl.BlockSpec((1, 2, L), lambda n: (n, 0, 0))),
        compiler_params=pltpu.CompilerParams(dimension_semantics=("parallel",)),
    )(xp2, wb)


# ----------------------------------------------------------------------------
# Kernel 2: lane-dense BN (precomputed scale/shift) + ReLU on (rows, W*C).
# ----------------------------------------------------------------------------
def bn_relu_kernel(z_ref, sc_ref, sh_ref, o_ref):
    o_ref[...] = jnp.maximum(z_ref[...] * sc_ref[...] + sh_ref[...], 0.0)


def bn_relu(z2d, scale_row, shift_row, rows_per_step):
    R, L = z2d.shape
    blk = pl.BlockSpec((rows_per_step, L), lambda i: (i, 0))
    vec = pl.BlockSpec((1, L), lambda i: (0, 0))
    return pl.pallas_call(
        bn_relu_kernel,
        out_shape=jax.ShapeDtypeStruct((R, L), jnp.float32),
        grid=(R // rows_per_step,),
        in_specs=[blk, vec, vec],
        out_specs=blk,
        compiler_params=pltpu.CompilerParams(dimension_semantics=("parallel",)),
    )(z2d, scale_row, shift_row)


# ----------------------------------------------------------------------------
# Kernel 3: fused BN + ReLU + 2x2 max-pool.
#   z_ref : (Hh, 2, Wh, 2C) view of the conv output (row pairs / col pairs)
#   s_ref : (Hh, 2, Wh, 2C) post-activation (the Encoder's `s`)
#   p_ref : (Hh, Wh, C)     pooled output
# ----------------------------------------------------------------------------
def bn_relu_pool_kernel(z_ref, sc_ref, sh_ref, s_ref, p_ref):
    C = p_ref.shape[2]
    h = jnp.maximum(z_ref[...] * sc_ref[...] + sh_ref[...], 0.0)
    s_ref[...] = h
    m = jnp.max(h, axis=1)                                # max over the H pair
    p_ref[...] = jnp.maximum(m[:, :, :C], m[:, :, C:])    # max over the W pair


def bn_relu_pool(z2d, scale2, shift2, N, H, W, C):
    Hh, Wh = H // 2, W // 2
    z4 = z2d.reshape(N * Hh, 2, Wh, 2 * C)                # contiguous view
    s4, p3 = pl.pallas_call(
        bn_relu_pool_kernel,
        out_shape=(jax.ShapeDtypeStruct((N * Hh, 2, Wh, 2 * C), jnp.float32),
                   jax.ShapeDtypeStruct((N * Hh, Wh, C), jnp.float32)),
        grid=(N,),
        in_specs=[pl.BlockSpec((Hh, 2, Wh, 2 * C), lambda n: (n, 0, 0, 0)),
                  pl.BlockSpec((1, 2 * C), lambda n: (0, 0)),
                  pl.BlockSpec((1, 2 * C), lambda n: (0, 0))],
        out_specs=(pl.BlockSpec((Hh, 2, Wh, 2 * C), lambda n: (n, 0, 0, 0)),
                   pl.BlockSpec((Hh, Wh, C), lambda n: (n, 0, 0))),
        compiler_params=pltpu.CompilerParams(dimension_semantics=("parallel",)),
    )(z4, scale2, shift2)
    return s4.reshape(N, H, W, C), p3.reshape(N, Hh, Wh, C)


# ----------------------------------------------------------------------------
# Plain-JAX glue: global BN statistics from per-image partial sums.
# ----------------------------------------------------------------------------
def bn_affine(st, gamma, beta, N, H, W, C):
    sums = st.reshape(N, 2, W, C).sum(axis=(0, 2))        # (2, C)
    cnt = jnp.float32(N * H * W)
    mean = sums[0] / cnt
    var = jnp.maximum(sums[1] / cnt - mean * mean, 0.0)
    scale = gamma * jax.lax.rsqrt(var + EPS)
    shift = beta - mean * scale
    return scale, shift


# ----------------------------------------------------------------------------
# Encoder forward
# ----------------------------------------------------------------------------
def encoder_forward(x_nchw, p):
    N, Cin, H, W = x_nchw.shape
    Cout = p["w1"].shape[0]
    assert H % 2 == 0 and W % 2 == 0
    x = jnp.transpose(x_nchw.astype(jnp.float32), (0, 2, 3, 1))     # NHWC

    def conv_stage(x_nhwc, w, gamma, beta):
        Ci = x_nhwc.shape[-1]
        xp = jnp.pad(x_nhwc, ((0, 0), (1, 1), (1, 1), (0, 0)))
        xp2 = xp.reshape(N, H + 2, (W + 2) * Ci)                    # lane-flat rows
        wb = conv3x3_banded_weights(w, W)
        # NOTE: conv bias is intentionally omitted -- training-mode BN's mean
        # subtraction cancels it exactly.
        z, st = conv3x3_with_stats(xp2, wb, H, W, Cout)
        scale, shift = bn_affine(st, gamma, beta, N, H, W, Cout)
        return z, scale, shift

    # stage 1: conv -> BN(batch stats) -> ReLU
    z1, sc1, sh1 = conv_stage(x, p["w1"], p["bn1_gamma"], p["bn1_beta"])
    h1 = bn_relu(z1, jnp.tile(sc1, W)[None, :], jnp.tile(sh1, W)[None, :],
                 rows_per_step=H)

    # stage 2: conv -> BN -> ReLU fused with 2x2 max-pool
    z2, sc2, sh2 = conv_stage(h1.reshape(N, H, W, Cout), p["w2"],
                              p["bn2_gamma"], p["bn2_beta"])
    s_nhwc, p_nhwc = bn_relu_pool(z2, jnp.tile(sc2, 2)[None, :],
                                  jnp.tile(sh2, 2)[None, :], N, H, W, Cout)

    s = jnp.transpose(s_nhwc, (0, 3, 1, 2))                         # NCHW
    pooled = jnp.transpose(p_nhwc, (0, 3, 1, 2))
    return s, pooled


# ----------------------------------------------------------------------------
# Parameters (deterministic, synthetic) and pure-JAX reference
# ----------------------------------------------------------------------------
def init_params(key, in_c, out_c):
    ks = jax.random.split(key, 8)
    nrm = lambda k, sh: jax.random.normal(k, sh, jnp.float32)
    p = {}
    p["w1"] = nrm(ks[0], (out_c, in_c, 3, 3)) / np.sqrt(9 * in_c)
    p["b1"] = 0.1 * nrm(ks[1], (out_c,))
    p["bn1_gamma"] = 1.0 + 0.1 * nrm(ks[2], (out_c,))
    p["bn1_beta"] = 0.1 * nrm(ks[3], (out_c,))
    p["w2"] = nrm(ks[4], (out_c, out_c, 3, 3)) / np.sqrt(9 * out_c)
    p["b2"] = 0.1 * nrm(ks[5], (out_c,))
    p["bn2_gamma"] = 1.0 + 0.1 * nrm(ks[6], (out_c,))
    p["bn2_beta"] = 0.1 * nrm(ks[7], (out_c,))
    return p


def ref_forward(x, p):
    def conv3x3(t, w, b):
        y = jax.lax.conv_general_dilated(
            t, w, (1, 1), ((1, 1), (1, 1)),
            dimension_numbers=("NCHW", "OIHW", "NCHW"))
        return y + b.reshape(1, -1, 1, 1)

    def bn(t, g, b):
        mu = jnp.mean(t, axis=(0, 2, 3), keepdims=True)
        var = jnp.mean((t - mu) ** 2, axis=(0, 2, 3), keepdims=True)
        return (g.reshape(1, -1, 1, 1) * (t - mu) * jax.lax.rsqrt(var + EPS)
                + b.reshape(1, -1, 1, 1))

    h = jnp.maximum(bn(conv3x3(x, p["w1"], p["b1"]),
                       p["bn1_gamma"], p["bn1_beta"]), 0.0)
    s = jnp.maximum(bn(conv3x3(h, p["w2"], p["b2"]),
                       p["bn2_gamma"], p["bn2_beta"]), 0.0)
    N, C, H, W = s.shape
    pool = s.reshape(N, C, H // 2, 2, W // 2, 2).max(axis=(3, 5))
    return s, pool


if __name__ == "__main__":
    key = jax.random.PRNGKey(0)
    N, Cin, Cout, H, W = 2, 4, 8, 16, 16        # W * Cout = 128 (lane aligned)
    kx, kp = jax.random.split(key)
    x = jax.random.normal(kx, (N, Cin, H, W), jnp.float32)
    params = init_params(kp, Cin, Cout)

    fwd = jax.jit(encoder_forward)
    s, pool = jax.block_until_ready(fwd(x, params))
    assert s.shape == (N, Cout, H, W)
    assert pool.shape == (N, Cout, H // 2, W // 2)

    ref_s, ref_p = ref_forward(x, params)
    np.testing.assert_allclose(np.asarray(s), np.asarray(ref_s),
                               rtol=2e-4, atol=2e-4)
    np.testing.assert_allclose(np.asarray(pool), np.asarray(ref_p),
                               rtol=2e-4, atol=2e-4)
    print("KERNEL_OK")
</pallas_src>

<mosaic_0001>
module attributes {stable_mosaic.version = 11 : i64} {
  func.func @conv3x3_stats_kernel(%arg0: i32, %arg1: memref<1x18x72xf32, #tpu.memory_space<vmem>>, %arg2: memref<3x72x128xf32, #tpu.memory_space<vmem>>, %arg3: memref<16x128xf32, #tpu.memory_space<vmem>>, %arg4: memref<1x2x128xf32, #tpu.memory_space<vmem>>) attributes {dimension_semantics = [#tpu.dimension_semantics<parallel>], iteration_bounds = array<i64: 2>, scalar_prefetch = 0 : i64, scratch_operands = 0 : i64, tpu.core_type = #tpu.core_type<tc>, window_params = [{transform_indices = @transform_0, window_bounds = array<i64: 1, 18, 72>}, {pipeline_mode = #tpu.pipeline_mode<synchronous>, transform_indices = @transform_1, window_bounds = array<i64: 3, 72, 128>}, {transform_indices = @transform_2, window_bounds = array<i64: 16, 128>}, {transform_indices = @transform_3, window_bounds = array<i64: 1, 2, 128>}]} {
    %c0 = arith.constant 0 : index
    %c0_0 = arith.constant 0 : index
    %c0_1 = arith.constant 0 : index
    %0 = vector.load %arg1[%c0, %c0_0, %c0_1] : memref<1x18x72xf32, #tpu.memory_space<vmem>>, vector<1x18x72xf32>
    %1 = vector.shape_cast %0 : vector<1x18x72xf32> to vector<18x72xf32>
    %cst = arith.constant 0.000000e+00 : f32
    %2 = vector.broadcast %cst : f32 to vector<16x128xf32>
    %3 = vector.extract_strided_slice %1 {offsets = [0, 0], sizes = [16, 72], strides = [1, 1]} : vector<18x72xf32> to vector<16x72xf32>
    %c0_2 = arith.constant 0 : index
    %c0_3 = arith.constant 0 : index
    %c0_4 = arith.constant 0 : index
    %4 = vector.load %arg2[%c0_2, %c0_3, %c0_4] : memref<3x72x128xf32, #tpu.memory_space<vmem>>, vector<1x72x128xf32>
    %5 = vector.shape_cast %4 : vector<1x72x128xf32> to vector<72x128xf32>
    %cst_5 = arith.constant dense<0.000000e+00> : vector<16x128xf32>
    %6 = tpu.matmul %3, %5, %cst_5 {dimension_numbers = #tpu.dot_dimension_numbers<[1], [0], [0], [1], [0, 0, 1, 1], [], []>} : vector<16x72xf32>, vector<72x128xf32>, vector<16x128xf32> -> vector<16x128xf32>
    %7 = arith.addf %2, %6 : vector<16x128xf32>
    %8 = vector.extract_strided_slice %1 {offsets = [1, 0], sizes = [16, 72], strides = [1, 1]} : vector<18x72xf32> to vector<16x72xf32>
    %c1 = arith.constant 1 : index
    %c0_6 = arith.constant 0 : index
    %c0_7 = arith.constant 0 : index
    %9 = vector.load %arg2[%c1, %c0_6, %c0_7] : memref<3x72x128xf32, #tpu.memory_space<vmem>>, vector<1x72x128xf32>
    %10 = vector.shape_cast %9 : vector<1x72x128xf32> to vector<72x128xf32>
    %cst_8 = arith.constant dense<0.000000e+00> : vector<16x128xf32>
    %11 = tpu.matmul %8, %10, %cst_8 {dimension_numbers = #tpu.dot_dimension_numbers<[1], [0], [0], [1], [0, 0, 1, 1], [], []>} : vector<16x72xf32>, vector<72x128xf32>, vector<16x128xf32> -> vector<16x128xf32>
    %12 = arith.addf %7, %11 : vector<16x128xf32>
    %13 = vector.extract_strided_slice %1 {offsets = [2, 0], sizes = [16, 72], strides = [1, 1]} : vector<18x72xf32> to vector<16x72xf32>
    %c2 = arith.constant 2 : index
    %c0_9 = arith.constant 0 : index
    %c0_10 = arith.constant 0 : index
    %14 = vector.load %arg2[%c2, %c0_9, %c0_10] : memref<3x72x128xf32, #tpu.memory_space<vmem>>, vector<1x72x128xf32>
    %15 = vector.shape_cast %14 : vector<1x72x128xf32> to vector<72x128xf32>
    %cst_11 = arith.constant dense<0.000000e+00> : vector<16x128xf32>
    %16 = tpu.matmul %13, %15, %cst_11 {dimension_numbers = #tpu.dot_dimension_numbers<[1], [0], [0], [1], [0, 0, 1, 1], [], []>} : vector<16x72xf32>, vector<72x128xf32>, vector<16x128xf32> -> vector<16x128xf32>
    %17 = arith.addf %12, %16 : vector<16x128xf32>
    %c0_12 = arith.constant 0 : index
    %c0_13 = arith.constant 0 : index
    %18 = vector.load %arg3[%c0_12, %c0_13] : memref<16x128xf32, #tpu.memory_space<vmem>>, vector<16x128xf32>
    tpu.vector_store %arg3[%c0_12, %c0_13], %17 {strides = array<i32>} : memref<16x128xf32, #tpu.memory_space<vmem>>, vector<16x128xf32>,
    %cst_14 = arith.constant dense<0.000000e+00> : vector<128xf32>
    %19 = vector.multi_reduction <add>, %17, %cst_14 [0] : vector<16x128xf32> to vector<128xf32>
    %20 = vector.shape_cast %19 : vector<128xf32> to vector<1x128xf32>
    %21 = arith.mulf %17, %17 : vector<16x128xf32>
    %cst_15 = arith.constant dense<0.000000e+00> : vector<128xf32>
    %22 = vector.multi_reduction <add>, %21, %cst_15 [0] : vector<16x128xf32> to vector<128xf32>
    %23 = vector.shape_cast %22 : vector<128xf32> to vector<1x128xf32>
    %24 = tpu.concatenate %20, %23 in 0 : vector<1x128xf32>, vector<1x128xf32> -> vector<2x128xf32>
    %c0_16 = arith.constant 0 : index
    %c0_17 = arith.constant 0 : index
    %c0_18 = arith.constant 0 : index
    %25 = vector.load %arg4[%c0_16, %c0_17, %c0_18] : memref<1x2x128xf32, #tpu.memory_space<vmem>>, vector<1x2x128xf32>
    %26 = vector.shape_cast %25 : vector<1x2x128xf32> to vector<2x128xf32>
    %27 = vector.shape_cast %24 : vector<2x128xf32> to vector<1x2x128xf32>
    tpu.vector_store %arg4[%c0_16, %c0_17, %c0_18], %27 {strides = array<i32>} : memref<1x2x128xf32, #tpu.memory_space<vmem>>, vector<1x2x128xf32>,
    return
  }
  func.func @transform_0(%arg0: i32) -> (i32, i32, i32) {
    %c0_i32 = arith.constant 0 : i32
    %c0_i32_0 = arith.constant 0 : i32
    %c0_i32_1 = arith.constant 0 : i32
    return %arg0, %c0_i32, %c0_i32_0 : i32, i32, i32
  }
  func.func @transform_1(%arg0: i32) -> (i32, i32, i32) {
    %c0_i32 = arith.constant 0 : i32
    %c0_i32_0 = arith.constant 0 : i32
    %c0_i32_1 = arith.constant 0 : i32
    %c0_i32_2 = arith.constant 0 : i32
    return %c0_i32, %c0_i32_0, %c0_i32_1 : i32, i32, i32
  }
  func.func @transform_2(%arg0: i32) -> (i32, i32) {
    %c0_i32 = arith.constant 0 : i32
    %c0_i32_0 = arith.constant 0 : i32
    return %arg0, %c0_i32 : i32, i32
  }
  func.func @transform_3(%arg0: i32) -> (i32, i32, i32) {
    %c0_i32 = arith.constant 0 : i32
    %c0_i32_0 = arith.constant 0 : i32
    %c0_i32_1 = arith.constant 0 : i32
    return %arg0, %c0_i32, %c0_i32_0 : i32, i32, i32
  }
}

module attributes {stable_mosaic.version = 11 : i64} {
  func.func @bn_relu_kernel(%arg0: i32, %arg1: memref<16x128xf32, #tpu.memory_space<vmem>>, %arg2: memref<1x128xf32, #tpu.memory_space<vmem>>, %arg3: memref<1x128xf32, #tpu.memory_space<vmem>>, %arg4: memref<16x128xf32, #tpu.memory_space<vmem>>) attributes {dimension_semantics = [#tpu.dimension_semantics<parallel>], iteration_bounds = array<i64: 2>, scalar_prefetch = 0 : i64, scratch_operands = 0 : i64, tpu.core_type = #tpu.core_type<tc>, window_params = [{transform_indices = @transform_0, window_bounds = array<i64: 16, 128>}, {pipeline_mode = #tpu.pipeline_mode<synchronous>, transform_indices = @transform_1, window_bounds = array<i64: 1, 128>}, {pipeline_mode = #tpu.pipeline_mode<synchronous>, transform_indices = @transform_2, window_bounds = array<i64: 1, 128>}, {transform_indices = @transform_3, window_bounds = array<i64: 16, 128>}]} {
    %c0 = arith.constant 0 : index
    %c0_0 = arith.constant 0 : index
    %0 = vector.load %arg1[%c0, %c0_0] : memref<16x128xf32, #tpu.memory_space<vmem>>, vector<16x128xf32>
    %c0_1 = arith.constant 0 : index
    %c0_2 = arith.constant 0 : index
    %1 = vector.load %arg2[%c0_1, %c0_2] : memref<1x128xf32, #tpu.memory_space<vmem>>, vector<1x128xf32>
    %2 = vector.broadcast %1 : vector<1x128xf32> to vector<16x128xf32>
    %3 = arith.mulf %0, %2 : vector<16x128xf32>
    %c0_3 = arith.constant 0 : index
    %c0_4 = arith.constant 0 : index
    %4 = vector.load %arg3[%c0_3, %c0_4] : memref<1x128xf32, #tpu.memory_space<vmem>>, vector<1x128xf32>
    %5 = vector.broadcast %4 : vector<1x128xf32> to vector<16x128xf32>
    %6 = arith.addf %3, %5 : vector<16x128xf32>
    %cst = arith.constant 0.000000e+00 : f32
    %7 = vector.broadcast %cst : f32 to vector<16x128xf32>
    %8 = arith.maximumf %6, %7 : vector<16x128xf32>
    %c0_5 = arith.constant 0 : index
    %c0_6 = arith.constant 0 : index
    %9 = vector.load %arg4[%c0_5, %c0_6] : memref<16x128xf32, #tpu.memory_space<vmem>>, vector<16x128xf32>
    tpu.vector_store %arg4[%c0_5, %c0_6], %8 {strides = array<i32>} : memref<16x128xf32, #tpu.memory_space<vmem>>, vector<16x128xf32>,
    return
  }
  func.func @transform_0(%arg0: i32) -> (i32, i32) {
    %c0_i32 = arith.constant 0 : i32
    %c0_i32_0 = arith.constant 0 : i32
    return %arg0, %c0_i32 : i32, i32
  }
  func.func @transform_1(%arg0: i32) -> (i32, i32) {
    %c0_i32 = arith.constant 0 : i32
    %c0_i32_0 = arith.constant 0 : i32
    %c0_i32_1 = arith.constant 0 : i32
    return %c0_i32, %c0_i32_0 : i32, i32
  }
  func.func @transform_2(%arg0: i32) -> (i32, i32) {
    %c0_i32 = arith.constant 0 : i32
    %c0_i32_0 = arith.constant 0 : i32
    %c0_i32_1 = arith.constant 0 : i32
    return %c0_i32, %c0_i32_0 : i32, i32
  }
  func.func @transform_3(%arg0: i32) -> (i32, i32) {
    %c0_i32 = arith.constant 0 : i32
    %c0_i32_0 = arith.constant 0 : i32
    return %arg0, %c0_i32 : i32, i32
  }
}

module attributes {stable_mosaic.version = 11 : i64} {
  func.func @conv3x3_stats_kernel(%arg0: i32, %arg1: memref<1x18x144xf32, #tpu.memory_space<vmem>>, %arg2: memref<3x144x128xf32, #tpu.memory_space<vmem>>, %arg3: memref<16x128xf32, #tpu.memory_space<vmem>>, %arg4: memref<1x2x128xf32, #tpu.memory_space<vmem>>) attributes {dimension_semantics = [#tpu.dimension_semantics<parallel>], iteration_bounds = array<i64: 2>, scalar_prefetch = 0 : i64, scratch_operands = 0 : i64, tpu.core_type = #tpu.core_type<tc>, window_params = [{transform_indices = @transform_0, window_bounds = array<i64: 1, 18, 144>}, {pipeline_mode = #tpu.pipeline_mode<synchronous>, transform_indices = @transform_1, window_bounds = array<i64: 3, 144, 128>}, {transform_indices = @transform_2, window_bounds = array<i64: 16, 128>}, {transform_indices = @transform_3, window_bounds = array<i64: 1, 2, 128>}]} {
    %c0 = arith.constant 0 : index
    %c0_0 = arith.constant 0 : index
    %c0_1 = arith.constant 0 : index
    %0 = vector.load %arg1[%c0, %c0_0, %c0_1] : memref<1x18x144xf32, #tpu.memory_space<vmem>>, vector<1x18x144xf32>
    %1 = vector.shape_cast %0 : vector<1x18x144xf32> to vector<18x144xf32>
    %cst = arith.constant 0.000000e+00 : f32
    %2 = vector.broadcast %cst : f32 to vector<16x128xf32>
    %3 = vector.extract_strided_slice %1 {offsets = [0, 0], sizes = [16, 144], strides = [1, 1]} : vector<18x144xf32> to vector<16x144xf32>
    %c0_2 = arith.constant 0 : index
    %c0_3 = arith.constant 0 : index
    %c0_4 = arith.constant 0 : index
    %4 = vector.load %arg2[%c0_2, %c0_3, %c0_4] : memref<3x144x128xf32, #tpu.memory_space<vmem>>, vector<1x144x128xf32>
    %5 = vector.shape_cast %4 : vector<1x144x128xf32> to vector<144x128xf32>
    %cst_5 = arith.constant dense<0.000000e+00> : vector<16x128xf32>
    %6 = tpu.matmul %3, %5, %cst_5 {dimension_numbers = #tpu.dot_dimension_numbers<[1], [0], [0], [1], [0, 0, 1, 1], [], []>} : vector<16x144xf32>, vector<144x128xf32>, vector<16x128xf32> -> vector<16x128xf32>
    %7 = arith.addf %2, %6 : vector<16x128xf32>
    %8 = vector.extract_strided_slice %1 {offsets = [1, 0], sizes = [16, 144], strides = [1, 1]} : vector<18x144xf32> to vector<16x144xf32>
    %c1 = arith.constant 1 : index
    %c0_6 = arith.constant 0 : index
    %c0_7 = arith.constant 0 : index
    %9 = vector.load %arg2[%c1, %c0_6, %c0_7] : memref<3x144x128xf32, #tpu.memory_space<vmem>>, vector<1x144x128xf32>
    %10 = vector.shape_cast %9 : vector<1x144x128xf32> to vector<144x128xf32>
    %cst_8 = arith.constant dense<0.000000e+00> : vector<16x128xf32>
    %11 = tpu.matmul %8, %10, %cst_8 {dimension_numbers = #tpu.dot_dimension_numbers<[1], [0], [0], [1], [0, 0, 1, 1], [], []>} : vector<16x144xf32>, vector<144x128xf32>, vector<16x128xf32> -> vector<16x128xf32>
    %12 = arith.addf %7, %11 : vector<16x128xf32>
    %13 = vector.extract_strided_slice %1 {offsets = [2, 0], sizes = [16, 144], strides = [1, 1]} : vector<18x144xf32> to vector<16x144xf32>
    %c2 = arith.constant 2 : index
    %c0_9 = arith.constant 0 : index
    %c0_10 = arith.constant 0 : index
    %14 = vector.load %arg2[%c2, %c0_9, %c0_10] : memref<3x144x128xf32, #tpu.memory_space<vmem>>, vector<1x144x128xf32>
    %15 = vector.shape_cast %14 : vector<1x144x128xf32> to vector<144x128xf32>
    %cst_11 = arith.constant dense<0.000000e+00> : vector<16x128xf32>
    %16 = tpu.matmul %13, %15, %cst_11 {dimension_numbers = #tpu.dot_dimension_numbers<[1], [0], [0], [1], [0, 0, 1, 1], [], []>} : vector<16x144xf32>, vector<144x128xf32>, vector<16x128xf32> -> vector<16x128xf32>
    %17 = arith.addf %12, %16 : vector<16x128xf32>
    %c0_12 = arith.constant 0 : index
    %c0_13 = arith.constant 0 : index
    %18 = vector.load %arg3[%c0_12, %c0_13] : memref<16x128xf32, #tpu.memory_space<vmem>>, vector<16x128xf32>
    tpu.vector_store %arg3[%c0_12, %c0_13], %17 {strides = array<i32>} : memref<16x128xf32, #tpu.memory_space<vmem>>, vector<16x128xf32>,
    %cst_14 = arith.constant dense<0.000000e+00> : vector<128xf32>
    %19 = vector.multi_reduction <add>, %17, %cst_14 [0] : vector<16x128xf32> to vector<128xf32>
    %20 = vector.shape_cast %19 : vector<128xf32> to vector<1x128xf32>
    %21 = arith.mulf %17, %17 : vector<16x128xf32>
    %cst_15 = arith.constant dense<0.000000e+00> : vector<128xf32>
    %22 = vector.multi_reduction <add>, %21, %cst_15 [0] : vector<16x128xf32> to vector<128xf32>
    %23 = vector.shape_cast %22 : vector<128xf32> to vector<1x128xf32>
    %24 = tpu.concatenate %20, %23 in 0 : vector<1x128xf32>, vector<1x128xf32> -> vector<2x128xf32>
    %c0_16 = arith.constant 0 : index
    %c0_17 = arith.constant 0 : index
    %c0_18 = arith.constant 0 : index
    %25 = vector.load %arg4[%c0_16, %c0_17, %c0_18] : memref<1x2x128xf32, #tpu.memory_space<vmem>>, vector<1x2x128xf32>
    %26 = vector.shape_cast %25 : vector<1x2x128xf32> to vector<2x128xf32>
    %27 = vector.shape_cast %24 : vector<2x128xf32> to vector<1x2x128xf32>
    tpu.vector_store %arg4[%c0_16, %c0_17, %c0_18], %27 {strides = array<i32>} : memref<1x2x128xf32, #tpu.memory_space<vmem>>, vector<1x2x128xf32>,
    return
  }
  func.func @transform_0(%arg0: i32) -> (i32, i32, i32) {
    %c0_i32 = arith.constant 0 : i32
    %c0_i32_0 = arith.constant 0 : i32
    %c0_i32_1 = arith.constant 0 : i32
    return %arg0, %c0_i32, %c0_i32_0 : i32, i32, i32
  }
  func.func @transform_1(%arg0: i32) -> (i32, i32, i32) {
    %c0_i32 = arith.constant 0 : i32
    %c0_i32_0 = arith.constant 0 : i32
    %c0_i32_1 = arith.constant 0 : i32
    %c0_i32_2 = arith.constant 0 : i32
    return %c0_i32, %c0_i32_0, %c0_i32_1 : i32, i32, i32
  }
  func.func @transform_2(%arg0: i32) -> (i32, i32) {
    %c0_i32 = arith.constant 0 : i32
    %c0_i32_0 = arith.constant 0 : i32
    return %arg0, %c0_i32 : i32, i32
  }
  func.func @transform_3(%arg0: i32) -> (i32, i32, i32) {
    %c0_i32 = arith.constant 0 : i32
    %c0_i32_0 = arith.constant 0 : i32
    %c0_i32_1 = arith.constant 0 : i32
    return %arg0, %c0_i32, %c0_i32_0 : i32, i32, i32
  }
}

module attributes {stable_mosaic.version = 11 : i64} {
  func.func @bn_relu_pool_kernel(%arg0: i32, %arg1: memref<8x2x8x16xf32, #tpu.memory_space<vmem>>, %arg2: memref<1x16xf32, #tpu.memory_space<vmem>>, %arg3: memref<1x16xf32, #tpu.memory_space<vmem>>, %arg4: memref<8x2x8x16xf32, #tpu.memory_space<vmem>>, %arg5: memref<8x8x8xf32, #tpu.memory_space<vmem>>) attributes {dimension_semantics = [#tpu.dimension_semantics<parallel>], iteration_bounds = array<i64: 2>, scalar_prefetch = 0 : i64, scratch_operands = 0 : i64, tpu.core_type = #tpu.core_type<tc>, window_params = [{transform_indices = @transform_0, window_bounds = array<i64: 8, 2, 8, 16>}, {pipeline_mode = #tpu.pipeline_mode<synchronous>, transform_indices = @transform_1, window_bounds = array<i64: 1, 16>}, {pipeline_mode = #tpu.pipeline_mode<synchronous>, transform_indices = @transform_2, window_bounds = array<i64: 1, 16>}, {transform_indices = @transform_3, window_bounds = array<i64: 8, 2, 8, 16>}, {transform_indices = @transform_4, window_bounds = array<i64: 8, 8, 8>}]} {
    %c0 = arith.constant 0 : index
    %c0_0 = arith.constant 0 : index
    %c0_1 = arith.constant 0 : index
    %c0_2 = arith.constant 0 : index
    %0 = vector.load %arg1[%c0, %c0_0, %c0_1, %c0_2] : memref<8x2x8x16xf32, #tpu.memory_space<vmem>>, vector<8x2x8x16xf32>
    %c0_3 = arith.constant 0 : index
    %c0_4 = arith.constant 0 : index
    %1 = vector.load %arg2[%c0_3, %c0_4] : memref<1x16xf32, #tpu.memory_space<vmem>>, vector<1x16xf32>
    %2 = vector.shape_cast %1 : vector<1x16xf32> to vector<1x1x1x16xf32>
    %3 = vector.broadcast %2 : vector<1x1x1x16xf32> to vector<8x2x8x16xf32>
    %4 = arith.mulf %0, %3 : vector<8x2x8x16xf32>
    %c0_5 = arith.constant 0 : index
    %c0_6 = arith.constant 0 : index
    %5 = vector.load %arg3[%c0_5, %c0_6] : memref<1x16xf32, #tpu.memory_space<vmem>>, vector<1x16xf32>
    %6 = vector.shape_cast %5 : vector<1x16xf32> to vector<1x1x1x16xf32>
    %7 = vector.broadcast %6 : vector<1x1x1x16xf32> to vector<8x2x8x16xf32>
    %8 = arith.addf %4, %7 : vector<8x2x8x16xf32>
    %cst = arith.constant 0.000000e+00 : f32
    %9 = vector.broadcast %cst : f32 to vector<8x2x8x16xf32>
    %10 = arith.maximumf %8, %9 : vector<8x2x8x16xf32>
    %c0_7 = arith.constant 0 : index
    %c0_8 = arith.constant 0 : index
    %c0_9 = arith.constant 0 : index
    %c0_10 = arith.constant 0 : index
    %11 = vector.load %arg4[%c0_7, %c0_8, %c0_9, %c0_10] : memref<8x2x8x16xf32, #tpu.memory_space<vmem>>, vector<8x2x8x16xf32>
    tpu.vector_store %arg4[%c0_7, %c0_8, %c0_9, %c0_10], %10 {strides = array<i32>} : memref<8x2x8x16xf32, #tpu.memory_space<vmem>>, vector<8x2x8x16xf32>,
    %cst_11 = arith.constant dense<0xFF800000> : vector<8x8x16xf32>
    %12 = vector.multi_reduction <maximumf>, %10, %cst_11 [1] : vector<8x2x8x16xf32> to vector<8x8x16xf32>
    %13 = vector.extract_strided_slice %12 {offsets = [0, 0, 0], sizes = [8, 8, 8], strides = [1, 1, 1]} : vector<8x8x16xf32> to vector<8x8x8xf32>
    %14 = vector.extract_strided_slice %12 {offsets = [0, 0, 8], sizes = [8, 8, 8], strides = [1, 1, 1]} : vector<8x8x16xf32> to vector<8x8x8xf32>
    %15 = arith.maximumf %13, %14 : vector<8x8x8xf32>
    %c0_12 = arith.constant 0 : index
    %c0_13 = arith.constant 0 : index
    %c0_14 = arith.constant 0 : index
    %16 = vector.load %arg5[%c0_12, %c0_13, %c0_14] : memref<8x8x8xf32, #tpu.memory_space<vmem>>, vector<8x8x8xf32>
    tpu.vector_store %arg5[%c0_12, %c0_13, %c0_14], %15 {strides = array<i32>} : memref<8x8x8xf32, #tpu.memory_space<vmem>>, vector<8x8x8xf32>,
    return
  }
  func.func @transform_0(%arg0: i32) -> (i32, i32, i32, i32) {
    %c0_i32 = arith.constant 0 : i32
    %c0_i32_0 = arith.constant 0 : i32
    %c0_i32_1 = arith.constant 0 : i32
    %c0_i32_2 = arith.constant 0 : i32
    return %arg0, %c0_i32, %c0_i32_0, %c0_i32_1 : i32, i32, i32, i32
  }
  func.func @transform_1(%arg0: i32) -> (i32, i32) {
    %c0_i32 = arith.constant 0 : i32
    %c0_i32_0 = arith.constant 0 : i32
    %c0_i32_1 = arith.constant 0 : i32
    return %c0_i32, %c0_i32_0 : i32, i32
  }
  func.func @transform_2(%arg0: i32) -> (i32, i32) {
    %c0_i32 = arith.constant 0 : i32
    %c0_i32_0 = arith.constant 0 : i32
    %c0_i32_1 = arith.constant 0 : i32
    return %c0_i32, %c0_i32_0 : i32, i32
  }
  func.func @transform_3(%arg0: i32) -> (i32, i32, i32, i32) {
    %c0_i32 = arith.constant 0 : i32
    %c0_i32_0 = arith.constant 0 : i32
    %c0_i32_1 = arith.constant 0 : i32
    %c0_i32_2 = arith.constant 0 : i32
    return %arg0, %c0_i32, %c0_i32_0, %c0_i32_1 : i32, i32, i32, i32
  }
  func.func @transform_4(%arg0: i32) -> (i32, i32, i32) {
    %c0_i32 = arith.constant 0 : i32
    %c0_i32_0 = arith.constant 0 : i32
    %c0_i32_1 = arith.constant 0 : i32
    return %arg0, %c0_i32, %c0_i32_0 : i32, i32, i32
  }
}

</mosaic_0001>

<bundles_post_ra>
// kernel: encoder_forward.4
= control target key start
LH: loop header
LB: loop body
LE: loop exit
PB: predicated region body
PF: predicated region fallthrough
CT: control target
= control target key end

     0   :  { %s798_s12 = smov 0   ;;  %s918_s0 = inlined_call_operand.vmem [shape: f32[2,18,72], index: 0, kind: input, shape index: {}]   ;;  %s919_s1 = inlined_call_operand.vmem [shape: f32[3,72,128], index: 1, kind: input, shape index: {}]   ;;  %s920_s2 = inlined_call_operand.vmem [shape: f32[32,128], index: 2, kind: output, shape index: {0}]   ;;  %s921_s3 = inlined_call_operand.vmem [shape: f32[2,2,128], index: 3, kind: output, shape index: {1}]  }
   0x1 LB: > { %s804_s13 = sadd.s32 4294967295, %s776_s12   ;;  %p582_p0 = scmp.ge.s32.totalorder %s776_s12, 1  ;;  %s776_s12 = sphi %s798_s12, %s14_s12  }
   0x2   : > { %p140_p1 = scmp.lt.s32.totalorder %s776_s12, 3 }
   0x4   : > { %p141_p2 = pnand %p582_p0, %p140_p1 }
   0x5   : > { %v186_v0 = vld [vmem:[%s919_s1] sm:$0xff] (!%p141_p2)  ;;  %v187_v1 = vld [vmem:[%s919_s1 + $0x8] sm:$0xff] (!%p141_p2)  ;;  %v188_v2 = vld [vmem:[%s919_s1 + $0x10] sm:$0xff] (!%p141_p2)  ;;  %p168_p3 = scmp.lt.s32.totalorder (!%p141_p2), %s804_s13, 1  ;;  %vm214_vm0 = vcmask (!%p141_p2), 588800   ;;  %vm208_vm1 = vcmask (!%p141_p2), 1046528  }
   0x6   : > { %144 = sbr.rel (%p141_p2) target bundleno = 277 (0x115), region = 28  ;;  %v725_v3 = vpack.c.bf16 (!%p141_p2), %v187_v1, %v186_v0  ;;  %v189_v4 = vld [vmem:[%s919_s1 + $0x18] sm:$0xff] (!%p141_p2)  ;;  %v190_v6 = vld [vmem:[%s919_s1 + $0x20] sm:$0xff] (!%p141_p2)  ;;  %v191_v7 = vld [vmem:[%s919_s1 + $0x28] sm:$0xff] (!%p141_p2)  ;;  %vm383_vm2 = vcmask (!%p141_p2), 1045504   ;;  %s584_s24 = sshll.u32 (!%p141_p2), %s804_s13, 1 }
   0x7   : > { %v729_v5 = vpack.c.bf16 (!%p141_p2), %v189_v4, %v188_v2  ;;  %v587_v8 = vld [vmem:[%s919_s1 + $0x48] sm:$0xff] (!%p141_p2)  ;;  %v588_v9 = vld [vmem:[%s919_s1 + $0x50] sm:$0xff] (!%p141_p2)  ;;  %v589_v11 = vld [vmem:[%s919_s1 + $0x58] sm:$0xff] (!%p141_p2)  ;;  %v733_v13 = vpack.c.bf16 (!%p141_p2), %v191_v7, %v190_v6  ;;  %p174_p4 = scmp.lt.s32.totalorder (!%p141_p2), %s584_s24, 3  ;;  %vm488_vm3 = vcmask (!%p141_p2), 1040384  }
   0x8   : > { %726 = vmatprep.subr.bf16.mxu0 (!%p141_p2), %v725_v3  ;;  %v709_v10 = vpack.c.bf16 (!%p141_p2), %v588_v9, %v587_v8  ;;  %v590_v12 = vld [vmem:[%s919_s1 + $0x60] sm:$0xff] (!%p141_p2)  ;;  %v591_v15 = vld [vmem:[%s919_s1 + $0x68] sm:$0xff] (!%p141_p2)  ;;  %v192_v16 = vld [vmem:[%s919_s1 + $0x30] sm:$0xff] (!%p141_p2) }
   0x9   : > { %728 = vmatpush3.bf16.msra.mxu0 (!%p141_p2), %v725_v3  ;;  %v713_v14 = vpack.c.bf16 (!%p141_p2), %v590_v12, %v589_v11  ;;  %v193_v17 = vld [vmem:[%s919_s1 + $0x38] sm:$0xff] (!%p141_p2)  ;;  %v592_v18 = vld [vmem:[%s919_s1 + $0x70] sm:$0xff] (!%p141_p2)  ;;  %v594_v25 = vld [vmem:[%s919_s1 + $0x80] sm:$0xff] (!%p141_p2) }
   0xa   : > { %730 = vmatprep.subr.bf16.mxu0 (!%p141_p2), %v729_v5  ;;  %710 = vmatprep.subr.bf16.mxu1 (!%p141_p2), %v709_v10  ;;  %v717_v22 = vpack.c.bf16 (!%p141_p2), %v592_v18, %v591_v15  ;;  %v737_v23 = vpack.c.bf16 (!%p141_p2), %v193_v17, %v192_v16  ;;  %v593_v24 = vld [vmem:[%s919_s1 + $0x78] sm:$0xff] (!%p141_p2)  ;;  %v194_v29 = vld [vmem:[%s919_s1 + $0x40] sm:$0xff] (!%p141_p2)  ;;  %v600_v31 = vld [vmem:[%s919_s1 + $0x90] sm:$0xff] (!%p141_p2) }
   0xb   : > { %712 = vmatpush3.bf16.msra.mxu1 (!%p141_p2), %v709_v10  ;;  %v721_v28 = vpack.c.bf16 (!%p141_p2), %v594_v25, %v593_v24  ;;  %v601_v32 = vld [vmem:[%s919_s1 + $0x98] sm:$0xff] (!%p141_p2)  ;;  %v602_v35 = vld [vmem:[%s919_s1 + $0xa0] sm:$0xff] (!%p141_p2)  ;;  %v603_v36 = vld [vmem:[%s919_s1 + $0xa8] sm:$0xff] (!%p141_p2) }
   0xc   : > { %714 = vmatprep.subr.bf16.mxu1 (!%p141_p2), %v713_v14  ;;  %v741_v38 = vpack.c.bf16 (!%p141_p2), %v601_v32, %v600_v31  ;;  %v595_v39 = vld [vmem:[%s919_s1 + $0x88] sm:$0xff] (!%p141_p2)  ;;  %v745_v40 = vpack.c.bf16 (!%p141_p2), %v603_v36, %v602_v35  ;;  %v604_v42 = vld [vmem:[%s919_s1 + $0xb0] sm:$0xff] (!%p141_p2)  ;;  %v605_v43 = vld [vmem:[%s919_s1 + $0xb8] sm:$0xff] (!%p141_p2) }
   0xd   : > { %s828_s26 = scalar_select %p168_p3, %s804_s13, 1  ;;  %732 = vmatpush3.bf16.msra.mxu0 %v729_v5  ;;  %v749_v45 = vpack.c.bf16 %v605_v43, %v604_v42  ;;  %v606_v46 = vld [vmem:[%s919_s1 + $0xc0] sm:$0xff]  ;;  %v607_v47 = vld [vmem:[%s919_s1 + $0xc8] sm:$0xff]  ;;  %v608_v50 = vld [vmem:[%s919_s1 + $0xd0] sm:$0xff] }
   0xe   : > { %734 = vmatprep.subr.bf16.mxu0 %v733_v13  ;;  %v753_v48 = vpack.c.bf16 %v607_v47, %v606_v46  ;;  %s923_s24 = smov (!%p174_p4, %s584_s24), 3 }
   0xf   : > { %s761_s4 = smul.u32 24, %s828_s26  ;;  %716 = vmatpush3.bf16.msra.mxu1 %v713_v14  ;;  %s585_s25 = sshll.u32 %s923_s24, 3 }
  0x10   : > { %718 = vmatprep.subr.bf16.mxu1 %v717_v22  ;;  %s177_s29 = scalar_lea.vmem %s920_s2, %s585_s25  ;;  %s586_s13 = sshll.u32 %s828_s26, 1 }
  0x11   : > { %s172_s19 = scalar_lea.vmem %s918_s0, %s761_s4  ;;  %736 = vmatpush3.bf16.msra.mxu0 %v733_v13  ;;  %s182_s5 = scalar_lea.vmem %s921_s3, %s586_s13 }
  0x12   : > { %v183_v19 = vld [vmem:[%s172_s19] sm:$0xff]  ;;  %v184_v21 = vld [vmem:[%s172_s19 + $0x8] sm:$0xff]  ;;  %738 = vmatprep.subr.bf16.mxu0 %v737_v23  ;;  %v185_v30 = vld [vmem:[%s172_s19 + $0x10] sm:$0x3] }
  0x13   : > { %v209_v20 = vrot.slane %v183_v19, 1  ;;  %685 = vmatprep.mubr.msk.f32.mxu0 %vm214_vm0, %v183_v19  ;;  %v210_v26 = vrot.slane %v184_v21, 1  ;;  %v384_v33 = vrot.slane %v183_v19, 2  ;;  %v385_v34 = vrot.slane %v184_v21, 2  ;;  %720 = vmatpush3.bf16.msra.mxu1 %v717_v22 }
  0x14   : > { %722 = vmatprep.subr.bf16.mxu1 %v721_v28  ;;  %v212_v37 = vrot.slane %v185_v30, 1  ;;  %v387_v49 = vrot.slane %v185_v30, 2 }
  0x15   : > { %v211_v27 = vsel %vm208_vm1, %v209_v20, %v210_v26  ;;  %740 = vmatpush3.bf16.msra.mxu0 %v737_v23  ;;  %v386_v41 = vsel %vm383_vm2, %v384_v33, %v385_v34 }
  0x16   : > { %664 = vmatprep.mubr.msk.f32.mxu1 %vm214_vm0, %v211_v27  ;;  %683 = vmatprep.subr.mxu0 %v194_v29  ;;  %v213_v44 = vsel %vm208_vm1, %v210_v26, %v212_v37  ;;  %v388_v51 = vsel %vm383_vm2, %v385_v34, %v387_v49 }
  0x17   : > { %724 = vmatpush3.bf16.msra.mxu1 %v721_v28 }
  0x18   : > { %662 = vmatprep.subr.mxu1 %v595_v39 }
  0x19   : > { %684 = vmatpush3.msra.mxu0 %v194_v29 }
  0x1a   : > { %742 = vmatprep.subr.bf16.mxu0 %v741_v38  ;;  %686 = vmatmul.mubr.msk.f32.vlgmr.msra.gmra.mrb[0].mxu0 %vm214_vm0, %v184_v21 }
  0x1b   : > { %744 = vmatpush3.bf16.msra.mxu0 %v741_v38  ;;  %706 = vmatprep.mubr.msk.f32.mxu0 %vm214_vm0, %v386_v41 }
  0x1c   : > { %746 = vmatprep.subr.bf16.mxu0 %v745_v40  ;;  %663 = vmatpush3.msra.mxu1 %v595_v39 }
  0x1d   : > { %665 = vmatmul.mubr.msk.f32.vlgmr.msra.gmra.mrb[0].mxu1 %vm214_vm0, %v213_v44 }
  0x1f   : > { %748 = vmatpush3.bf16.msra.mxu0 %v745_v40 }
  0x20   : > { %750 = vmatprep.subr.bf16.mxu0 %v749_v45 }
  0x23   : > { %752 = vmatpush3.bf16.msra.mxu0 %v749_v45 }
  0x24   : > { %754 = vmatprep.subr.bf16.mxu0 %v753_v48 }
  0x27   : > { %756 = vmatpush3.bf16.msra.mxu0 %v753_v48 }
  0x28   : > { %704 = vmatprep.subr.mxu0 %v608_v50 }
  0x2b   : > { %705 = vmatpush3.msra.mxu0 %v608_v50 }
  0x2c   : > { %707 = vmatmul.mubr.msk.f32.vlgmr.msra.gmra.mrb[0].mxu0 %vm214_vm0, %v388_v51 }
  0xf0   : > { %v666_v52 = vpop.f32.mrb[0].mxu1 }
  0xf1   : > { %v285_v53 = vpop.f32.mrb[1].mxu1 }
  0xff   : > { %v708_v54 = vpop.f32.mrb[0].mxu0 }
 0x100   : > { %v757_v55 = vadd.f32 %v708_v54, %v666_v52  ;;  %v459_v56 = vpop.f32.mrb[1].mxu0 }
 0x101   : > { %v758_v57 = vadd.f32 %v459_v56, %v285_v53 }
 0x102   : > { %v480_v58 = vmul.f32 %v757_v55, %v757_v55  ;;  %471 = vst [vmem:[%s177_s29 + $0x8] sm:$0xff] %v757_v55 }
 0x103   : > { %470 = vst [vmem:[%s177_s29] sm:$0xff] %v758_v57  ;;  %v472_v59 = vadd.f32 %v758_v57, %v757_v55  ;;  %v479_v60 = vmul.f32 %v758_v57, %v758_v57 }
 0x105   : > { %v473_v61 = vrot.slane %v472_v59, 4  ;;  %v481_v62 = vadd.f32 %v480_v58, %v479_v60 }
 0x107   : > { %v474_v63 = vadd.f32 %v473_v61, %v472_v59  ;;  %v482_v0 = vrot.slane %v481_v62, 4 }
 0x109   : > { %v475_v1 = vrot.slane %v474_v63, 2  ;;  %v483_v2 = vadd.f32 %v482_v0, %v481_v62 }
 0x10b   : > { %v476_v3 = vadd.f32 %v475_v1, %v474_v63  ;;  %v484_v4 = vrot.slane %v483_v2, 2 }
 0x10d   : > { %v477_v5 = vrot.slane %v476_v3, 1  ;;  %v485_v6 = vadd.f32 %v484_v4, %v483_v2 }
 0x10f   : > { %v486_v7 = vrot.slane %v485_v6, 1  ;;  %v478_v8 = vadd.f32 %v477_v5, %v476_v3 }
 0x111   : > { %v487_v9 = vadd.f32 %v486_v7, %v485_v6 }
 0x113   : > { %v489_v10 = vsel %vm488_vm3, %v478_v8, %v487_v9 }
 0x114   : > { %490 = vst [vmem:[%s182_s5] sm:$0x3] %v489_v10 }
 0x115 PF: > { %s14_s12 = sadd.s32 1, %s776_s12  }
 0x116   : > { %p11_p5 = scmp.ge.s32.totalorder %s14_s12, 4  }
 0x118   :  { %13 = sbr.rel (!%p11_p5) target bundleno = 1 (0x1), region = 72 }

// kernel: tile.23
= control target key start
LH: loop header
LB: loop body
LE: loop exit
PB: predicated region body
PF: predicated region fallthrough
CT: control target
= control target key end

     0   :  { %s28_s0 = inlined_call_operand.vmem [shape: f32[8], index: 0, kind: input, shape index: {}]   ;;  %s29_s1 = inlined_call_operand.vmem [shape: f32[16,8], index: 1, kind: output, shape index: {}]  }
   0x1   :  { %v4_v0 = vld [vmem:[%s28_s0] ss:$0 sm:$0xff] }
   0x2   :  { %5 = vst [vmem:[%s29_s1] sm:$0xff] %v4_v0  ;;  %8 = vst [vmem:[%s29_s1 + $0x8] sm:$0xff] %v4_v0 }

// kernel: tile.24
= control target key start
LH: loop header
LB: loop body
LE: loop exit
PB: predicated region body
PF: predicated region fallthrough
CT: control target
= control target key end

     0   :  { %s131_s10 = smov 120   ;;  %s132_s11 = smov 104   ;;  %vm3_vm0 = vcmask 64512   ;;  %vm9_vm1 = vcmask 1048512   ;;  %vm15_vm2 = vcmask 982912   ;;  %vm21_vm3 = vcmask 917312   ;;  %s207_s0 = inlined_call_operand.vmem [shape: f32[16,8], index: 0, kind: input, shape index: {}]   ;;  %s208_s1 = inlined_call_operand.vmem [shape: f32[1,128], index: 1, kind: output, shape index: {}]  }
   0x1   :  { %v101_v0 = vld [vmem:[%s207_s0 + $0xf] sm:$0x1]   ;;  %v103_v1 = vld [vmem:[%s207_s0 + $0xd] sm:$0x1]   ;;  %v102_v2 = vld [vmem:[%s207_s0 + $0xe] sm:$0x1]  }
   0x2   :  { %7 = vrot.lane.b32.xlu0 %v101_v0, %s131_s10  ;;  %19 = vrot.lane.b32.xlu1 %v103_v1, %s132_s11  ;;  %v104_v3 = vld [vmem:[%s207_s0 + $0xc] sm:$0x1]   ;;  %s133_s16 = smov 112   ;;  %s134_s17 = smov 96   ;;  %v105_v4 = vld [vmem:[%s207_s0 + $0xb] sm:$0x1]  }
   0x3   :  { %v106_v5 = vld [vmem:[%s207_s0 + $0xa] sm:$0x1]   ;;  %v2_v6 = vld [vmem:[%s207_s0] sm:$0x1]   ;;  %s135_s24 = smov 88   ;;  %s136_s25 = smov 80  }
   0x4   :  { %4 = vst.msk [vmem:[#allocation0] sm:$0x1] %vm3_vm0, %v2_v6   ;;  %v107_v7 = vld [vmem:[%s207_s0 + $0x9] sm:$0x1]   ;;  %v108_v8 = vld [vmem:[%s207_s0 + $0x8] sm:$0x1]  }
   0x5   :  { %s137_s30 = smov 72   ;;  %s138_s2 = smov 64   ;;  %v109_v9 = vld [vmem:[%s207_s0 + $0x7] sm:$0x1]   ;;  %v110_v10 = vld [vmem:[%s207_s0 + $0x6] sm:$0x1]  }
   0x6   :  { %13 = vrot.lane.b32.xlu0 %v102_v2, %s133_s16  ;;  %25 = vrot.lane.b32.xlu1 %v104_v3, %s134_s17  ;;  %s139_s7 = smov 56   ;;  %s140_s8 = smov 48   ;;  %v111_v11 = vld [vmem:[%s207_s0 + $0x5] sm:$0x1]   ;;  %v112_v12 = vld [vmem:[%s207_s0 + $0x4] sm:$0x1]  }
   0x7   :  { %s141_s13 = smov 40   ;;  %s142_s14 = smov 32   ;;  %v113_v13 = vld [vmem:[%s207_s0 + $0x3] sm:$0x1]   ;;  %v114_v14 = vld [vmem:[%s207_s0 + $0x2] sm:$0x1]  }
   0x8   :  { %s143_s19 = smov 24   ;;  %s144_s20 = smov 16   ;;  %v115_v15 = vld [vmem:[%s207_s0 + $0x1] sm:$0x1]   ;;  %vm27_vm4 = vcmask 851712   ;;  %vm33_vm5 = vcmask 786112  }
   0x9   :  { %s145_s0 = smov 8   ;;  %vm39_vm6 = vcmask 720512   ;;  %vm45_vm7 = vcmask 654912   ;;  %vm51_vm8 = vcmask 589312   ;;  %vm57_vm9 = vcmask 523712  }
   0xa   :  { %31 = vrot.lane.b32.xlu0 %v105_v4, %s135_s24  ;;  %37 = vrot.lane.b32.xlu1 %v106_v5, %s136_s25  ;;  %vm63_vm10 = vcmask 458112   ;;  %vm69_vm11 = vcmask 392512   ;;  %vm75_vm12 = vcmask 326912   ;;  %vm81_vm13 = vcmask 261312  }
   0xb   :  { %vm87_vm14 = vcmask 195712   ;;  %vm93_vm15 = vcmask 130112  }
   0xe   :  { %43 = vrot.lane.b32.xlu0 %v107_v7, %s137_s30  ;;  %49 = vrot.lane.b32.xlu1 %v108_v8, %s138_s2 }
  0x12   :  { %55 = vrot.lane.b32.xlu0 %v109_v9, %s139_s7  ;;  %61 = vrot.lane.b32.xlu1 %v110_v10, %s140_s8 }
  0x16   :  { %67 = vrot.lane.b32.xlu0 %v111_v11, %s141_s13  ;;  %73 = vrot.lane.b32.xlu1 %v112_v12, %s142_s14 }
  0x1a   :  { %79 = vrot.lane.b32.xlu0 %v113_v13, %s143_s19  ;;  %85 = vrot.lane.b32.xlu1 %v114_v14, %s144_s20 }
  0x1e   :  { %91 = vrot.lane.b32.xlu0 %v115_v15, %s145_s0 }
  0x74   :  { %v8_v16 = vpop.permute.xlu0 %7   ;;  %v20_v17 = vpop.permute.xlu1 %19  }
  0x75   :  { %10 = vst.msk [vmem:[#allocation0] sm:$0x1] %vm9_vm1, %v8_v16  }
  0x78   :  { %v14_v18 = vpop.permute.xlu0 %13   ;;  %v26_v19 = vpop.permute.xlu1 %25  }
  0x79   :  { %16 = vst.msk [vmem:[#allocation0] sm:$0x1] %vm15_vm2, %v14_v18  }
  0x7a   :  { %22 = vst.msk [vmem:[#allocation0] sm:$0x1] %vm21_vm3, %v20_v17  }
  0x7b   :  { %28 = vst.msk [vmem:[#allocation0] sm:$0x1] %vm27_vm4, %v26_v19  }
  0x7c   :  { %v32_v20 = vpop.permute.xlu0 %31   ;;  %v38_v21 = vpop.permute.xlu1 %37  }
  0x7d   :  { %34 = vst.msk [vmem:[#allocation0] sm:$0x1] %vm33_vm5, %v32_v20  }
  0x7e   :  { %40 = vst.msk [vmem:[#allocation0] sm:$0x1] %vm39_vm6, %v38_v21  }
  0x80   :  { %v44_v22 = vpop.permute.xlu0 %43   ;;  %v50_v23 = vpop.permute.xlu1 %49  }
  0x81   :  { %46 = vst.msk [vmem:[#allocation0] sm:$0x1] %vm45_vm7, %v44_v22  }
  0x82   :  { %52 = vst.msk [vmem:[#allocation0] sm:$0x1] %vm51_vm8, %v50_v23  }
  0x84   :  { %v56_v24 = vpop.permute.xlu0 %55   ;;  %v62_v25 = vpop.permute.xlu1 %61  }
  0x85   :  { %58 = vst.msk [vmem:[#allocation0] sm:$0x1] %vm57_vm9, %v56_v24  }
  0x86   :  { %64 = vst.msk [vmem:[#allocation0] sm:$0x1] %vm63_vm10, %v62_v25  }
  0x88   :  { %v68_v26 = vpop.permute.xlu0 %67   ;;  %v74_v27 = vpop.permute.xlu1 %73  }
  0x89   :  { %70 = vst.msk [vmem:[#allocation0] sm:$0x1] %vm69_vm11, %v68_v26  }
  0x8a   :  { %76 = vst.msk [vmem:[#allocation0] sm:$0x1] %vm75_vm12, %v74_v27  }
  0x8c   :  { %v80_v28 = vpop.permute.xlu0 %79   ;;  %v86_v29 = vpop.permute.xlu1 %85  }
  0x8d   :  { %82 = vst.msk [vmem:[#allocation0] sm:$0x1] %vm81_vm13, %v80_v28  }
  0x8e   :  { %88 = vst.msk [vmem:[#allocation0] sm:$0x1] %vm87_vm14, %v86_v29  }
  0x90   :  { %v92_v30 = vpop.permute.xlu0 %91  }
  0x91   :  { %94 = vst.msk [vmem:[#allocation0] sm:$0x1] %vm93_vm15, %v92_v30  }
  0x98   :  { %v98_v31 = vld [vmem:[#allocation0] sm:$0x1] }
  0x99   :  { %100 = vst [vmem:[%s208_s1] sm:$0x1] %v98_v31 }

// kernel: encoder_forward.5
= control target key start
LH: loop header
LB: loop body
LE: loop exit
PB: predicated region body
PF: predicated region fallthrough
CT: control target
= control target key end

     0   :  { %s303_s12 = smov 0   ;;  %s320_s0 = inlined_call_operand.vmem [shape: f32[32,128], index: 0, kind: input, shape index: {}]   ;;  %s321_s1 = inlined_call_operand.vmem [shape: f32[1,128], index: 1, kind: input, shape index: {}]   ;;  %s322_s2 = inlined_call_operand.vmem [shape: f32[1,128], index: 2, kind: input, shape index: {}]   ;;  %s323_s3 = inlined_call_operand.vmem [shape: f32[32,128], index: 3, kind: output, shape index: {}]  }
   0x1 LB: > { %s254_s13 = sadd.s32 4294967295, %s281_s12   ;;  %p258_p0 = scmp.ge.s32.totalorder %s281_s12, 1  ;;  %s281_s12 = sphi %s303_s12, %s13_s12  }
   0x2   : > { %p138_p1 = scmp.lt.s32.totalorder %s281_s12, 3 }
   0x4   : > { %p139_p2 = pnand %p258_p0, %p138_p1 }
   0x5   : > { %s259_s14 = sshll.u32 (!%p139_p2), %s254_s13, 1  ;;  %v263_v0 = vld [vmem:[%s321_s1] ss:$0 sm:$0xff] (!%p139_p2) }
   0x6   : > { %142 = sbr.rel (%p139_p2) target bundleno = 24 (0x18), region = 32  ;;  %p163_p3 = scmp.lt.s32.totalorder (!%p139_p2), %s259_s14, 3  ;;  %v264_v3 = vld [vmem:[%s322_s2] ss:$0 sm:$0xff] (!%p139_p2) }
   0xd   : > { %s325_s14 = smov (!%p163_p3, %s259_s14), 3 }
   0xe   : > { %s260_s15 = sshll.u32 %s325_s14, 3 }
   0xf   : > { %s166_s20 = scalar_lea.vmem %s320_s0, %s260_s15  ;;  %s172_s25 = scalar_lea.vmem %s323_s3, %s260_s15 }
  0x10   : > { %v174_v1 = vld [vmem:[%s166_s20] sm:$0xff]  ;;  %v175_v2 = vld [vmem:[%s166_s20 + $0x8] sm:$0xff] }
  0x11   : > { %v183_v4 = vmul.f32 %v263_v0, %v174_v1  ;;  %v184_v5 = vmul.f32 %v263_v0, %v175_v2 }
  0x13   : > { %v192_v6 = vadd.f32 %v264_v3, %v183_v4  ;;  %v193_v7 = vadd.f32 %v264_v3, %v184_v5 }
  0x15   : > { %v194_v8 = vmax.f32 %v192_v6, 0.0  ;;  %v195_v9 = vmax.f32 %v193_v7, 0.0 }
  0x17   : > { %196 = vst [vmem:[%s172_s25] sm:$0xff] %v194_v8  ;;  %197 = vst [vmem:[%s172_s25 + $0x8] sm:$0xff] %v195_v9 }
  0x18 PF: > { %s13_s12 = sadd.s32 1, %s281_s12  }
  0x19   : > { %p10_p4 = scmp.ge.s32.totalorder %s13_s12, 4  }
  0x1b   :  { %12 = sbr.rel (!%p10_p4) target bundleno = 1 (0x1), region = 62 }

// kernel: tile.33
= control target key start
LH: loop header
LB: loop body
LE: loop exit
PB: predicated region body
PF: predicated region fallthrough
CT: control target
= control target key end

     0   :  { %s22_s0 = inlined_call_operand.vmem [shape: f32[8], index: 0, kind: input, shape index: {}]   ;;  %s23_s1 = inlined_call_operand.vmem [shape: f32[2,8], index: 1, kind: output, shape index: {}]  }
   0x1   :  { %v4_v0 = vld [vmem:[%s22_s0] ss:$0 sm:$0xff] }
   0x2   :  { %5 = vst [vmem:[%s23_s1] sm:$0x3] %v4_v0 }

// kernel: tile.34
= control target key start
LH: loop header
LB: loop body
LE: loop exit
PB: predicated region body
PF: predicated region fallthrough
CT: control target
= control target key end

     0   :  { %vm7_vm0 = vcmask 64512   ;;  %vm13_vm1 = vcmask 130112   ;;  %s39_s0 = inlined_call_operand.vmem [shape: f32[2,8], index: 0, kind: input, shape index: {}]   ;;  %s40_s1 = inlined_call_operand.vmem [shape: f32[1,16], index: 1, kind: output, shape index: {}]  }
   0x1   :  { %v4_v0 = vld [vmem:[%s39_s0] sm:$0x3]  ;;  %s22_s0 = smov 8  }
   0x2   :  { %5 = vst [vmem:[#allocation1] sm:$0x3] %v4_v0 }
   0x9   :  { %v10_v1 = vld [vmem:[#allocation1 + $0x1] sm:$0x1]   ;;  %v6_v2 = vld [vmem:[#allocation1] sm:$0x1]  }
   0xa   :  { %11 = vrot.lane.b32.xlu0 %v10_v1, %s22_s0  ;;  %8 = vst.msk [vmem:[#allocation0] sm:$0x1] %vm7_vm0, %v6_v2  }
  0x7c   :  { %v12_v3 = vpop.permute.xlu0 %11  }
  0x7d   :  { %14 = vst.msk [vmem:[#allocation0] sm:$0x1] %vm13_vm1, %v12_v3  }
  0x84   :  { %v18_v4 = vld [vmem:[#allocation0] sm:$0x1] }
  0x85   :  { %20 = vst [vmem:[%s40_s1] sm:$0x1] %v18_v4 }

// kernel: encoder_forward.6
= control target key start
LH: loop header
LB: loop body
LE: loop exit
PB: predicated region body
PF: predicated region fallthrough
CT: control target
= control target key end

     0   :  { %s821_s12 = smov 0   ;;  %s1098_s0 = inlined_call_operand.vmem [shape: f32[2,18,144], index: 0, kind: input, shape index: {}]   ;;  %s1099_s1 = inlined_call_operand.vmem [shape: f32[3,144,128], index: 1, kind: input, shape index: {}]   ;;  %s1100_s2 = inlined_call_operand.vmem [shape: f32[32,128], index: 2, kind: output, shape index: {0}]   ;;  %s1101_s3 = inlined_call_operand.vmem [shape: f32[2,2,128], index: 3, kind: output, shape index: {1}]  }
   0x1 LB: > { %s827_s13 = sadd.s32 4294967295, %s798_s12   ;;  %p629_p0 = scmp.ge.s32.totalorder %s798_s12, 1  ;;  %s798_s12 = sphi %s821_s12, %s14_s12  }
   0x2   : > { %p140_p1 = scmp.lt.s32.totalorder %s798_s12, 3 }
   0x4   : > { %p141_p2 = pnand %p629_p0, %p140_p1 }
   0x5   : > { %v634_v0 = vld [vmem:[%s1099_s1 + $0x90] sm:$0xff] (!%p141_p2)  ;;  %v635_v1 = vld [vmem:[%s1099_s1 + $0x98] sm:$0xff] (!%p141_p2)  ;;  %v189_v2 = vld [vmem:[%s1099_s1] sm:$0xff] (!%p141_p2)  ;;  %p168_p3 = scmp.lt.s32.totalorder (!%p141_p2), %s827_s13, 1  ;;  %v800_v3 = vmov (!%p141_p2), 0.0|0.0   ;;  %vm245_vm0 = vcmask (!%p141_p2), 130048  }
   0x6   : > { %144 = sbr.rel (%p141_p2) target bundleno = 312 (0x138), region = 28  ;;  %678 = vmatprep.subr.bf16.mxu1 (!%p141_p2), %v800_v3  ;;  %705 = vmatprep.subr.bf16.mxu0 (!%p141_p2), %v800_v3  ;;  %v679_v4 = vpack.c.bf16 (!%p141_p2), %v635_v1, %v634_v0  ;;  %v190_v5 = vld [vmem:[%s1099_s1 + $0x8] sm:$0xff] (!%p141_p2)  ;;  %v636_v6 = vld [vmem:[%s1099_s1 + $0xa0] sm:$0xff] (!%p141_p2)  ;;  %v191_v9 = vld [vmem:[%s1099_s1 + $0x10] sm:$0xff] (!%p141_p2)  ;;  %vm232_vm1 = vcmask (!%p141_p2), 1046528   ;;  %vm423_vm2 = vcmask (!%p141_p2), 1045504  }
   0x7   : > { %v637_v7 = vld [vmem:[%s1099_s1 + $0xa8] sm:$0xff] (!%p141_p2)  ;;  %v706_v8 = vpack.c.bf16 (!%p141_p2), %v190_v5, %v189_v2  ;;  %v192_v10 = vld [vmem:[%s1099_s1 + $0x18] sm:$0xff] (!%p141_p2)  ;;  %v638_v13 = vld [vmem:[%s1099_s1 + $0xb0] sm:$0xff] (!%p141_p2)  ;;  %s631_s5 = sshll.u32 (!%p141_p2), %s827_s13, 1  ;;  %vm535_vm3 = vcmask (!%p141_p2), 1040384  }
   0x8   : > { %680 = vmatpush1.bf16.msra.mxu1 (!%p141_p2), %v679_v4  ;;  %v682_v11 = vpack.c.bf16 (!%p141_p2), %v637_v7, %v636_v6  ;;  %v709_v12 = vpack.c.bf16 (!%p141_p2), %v192_v10, %v191_v9  ;;  %v639_v14 = vld [vmem:[%s1099_s1 + $0xb8] sm:$0xff] (!%p141_p2)  ;;  %v193_v15 = vld [vmem:[%s1099_s1 + $0x20] sm:$0xff] (!%p141_p2)  ;;  %v194_v16 = vld [vmem:[%s1099_s1 + $0x28] sm:$0xff] (!%p141_p2)  ;;  %p174_p4 = scmp.lt.s32.totalorder (!%p141_p2), %s631_s5, 3 }
   0x9   : > { %707 = vmatpush1.bf16.msra.mxu0 (!%p141_p2), %v706_v8  ;;  %681 = vmatprep.subr.bf16.mxu1 (!%p141_p2), %v800_v3  ;;  %v685_v17 = vpack.c.bf16 (!%p141_p2), %v639_v14, %v638_v13  ;;  %v712_v18 = vpack.c.bf16 (!%p141_p2), %v194_v16, %v193_v15  ;;  %v640_v19 = vld [vmem:[%s1099_s1 + $0xc0] sm:$0xff] (!%p141_p2)  ;;  %v641_v20 = vld [vmem:[%s1099_s1 + $0xc8] sm:$0xff] (!%p141_p2)  ;;  %v195_v21 = vld [vmem:[%s1099_s1 + $0x30] sm:$0xff] (!%p141_p2) }
   0xa   : > { %708 = vmatprep.subr.bf16.mxu0 (!%p141_p2), %v800_v3  ;;  %v196_v22 = vld [vmem:[%s1099_s1 + $0x38] sm:$0xff] (!%p141_p2)  ;;  %v688_v23 = vpack.c.bf16 (!%p141_p2), %v641_v20, %v640_v19  ;;  %v642_v24 = vld [vmem:[%s1099_s1 + $0xd0] sm:$0xff] (!%p141_p2)  ;;  %v197_v29 = vld [vmem:[%s1099_s1 + $0x40] sm:$0xff] (!%p141_p2) }
   0xb   : > { %v715_v25 = vpack.c.bf16 (!%p141_p2), %v196_v22, %v195_v21  ;;  %v643_v26 = vld [vmem:[%s1099_s1 + $0xd8] sm:$0xff] (!%p141_p2)  ;;  %v198_v30 = vld [vmem:[%s1099_s1 + $0x48] sm:$0xff] (!%p141_p2)  ;;  %v644_v36 = vld [vmem:[%s1099_s1 + $0xe0] sm:$0xff] (!%p141_p2) }
   0xc   : > { %683 = vmatpush1.bf16.msra.mxu1 (!%p141_p2), %v682_v11  ;;  %v691_v33 = vpack.c.bf16 (!%p141_p2), %v643_v26, %v642_v24  ;;  %v718_v35 = vpack.c.bf16 (!%p141_p2), %v198_v30, %v197_v29  ;;  %v645_v37 = vld [vmem:[%s1099_s1 + $0xe8] sm:$0xff] (!%p141_p2)  ;;  %v199_v38 = vld [vmem:[%s1099_s1 + $0x50] sm:$0xff] (!%p141_p2)  ;;  %v200_v39 = vld [vmem:[%s1099_s1 + $0x58] sm:$0xff] (!%p141_p2) }
   0xd   : > { %s859_s30 = scalar_select %p168_p3, %s827_s13, 1  ;;  %710 = vmatpush1.bf16.msra.mxu0 %v709_v12  ;;  %684 = vmatprep.subr.bf16.mxu1 %v800_v3  ;;  %v694_v40 = vpack.c.bf16 %v645_v37, %v644_v36  ;;  %v721_v41 = vpack.c.bf16 %v200_v39, %v199_v38  ;;  %v646_v42 = vld [vmem:[%s1099_s1 + $0xf0] sm:$0xff]  ;;  %v647_v43 = vld [vmem:[%s1099_s1 + $0xf8] sm:$0xff]  ;;  %v201_v44 = vld [vmem:[%s1099_s1 + $0x60] sm:$0xff] }
   0xe   : > { %711 = vmatprep.subr.bf16.mxu0 %v800_v3  ;;  %v202_v45 = vld [vmem:[%s1099_s1 + $0x68] sm:$0xff]  ;;  %v697_v46 = vpack.c.bf16 %v647_v43, %v646_v42  ;;  %v648_v48 = vld [vmem:[%s1099_s1 + $0x100] sm:$0xff]  ;;  %v203_v50 = vld [vmem:[%s1099_s1 + $0x70] sm:$0xff]  ;;  %s1103_s5 = smov (!%p174_p4, %s631_s5), 3 }
   0xf   : > { %s782_s14 = smul.u32 48, %s859_s30  ;;  %v724_v47 = vpack.c.bf16 %v202_v45, %v201_v44  ;;  %v649_v49 = vld [vmem:[%s1099_s1 + $0x108] sm:$0xff]  ;;  %v204_v51 = vld [vmem:[%s1099_s1 + $0x78] sm:$0xff]  ;;  %v650_v53 = vld [vmem:[%s1099_s1 + $0x110] sm:$0xff]  ;;  %s632_s6 = sshll.u32 %s1103_s5, 3 }
  0x10   : > { %686 = vmatpush1.bf16.msra.mxu1 %v685_v17  ;;  %v700_v52 = vpack.c.bf16 %v649_v49, %v648_v48  ;;  %v727_v54 = vpack.c.bf16 %v204_v51, %v203_v50  ;;  %v651_v55 = vld [vmem:[%s1099_s1 + $0x118] sm:$0xff]  ;;  %v205_v58 = vld [vmem:[%s1099_s1 + $0x80] sm:$0xff]  ;;  %v206_v59 = vld [vmem:[%s1099_s1 + $0x88] sm:$0xff]  ;;  %s177_s9 = scalar_lea.vmem %s1100_s2, %s632_s6  ;;  %s633_s13 = sshll.u32 %s859_s30, 1 }
  0x11   : > { %s893_s25 = scalar_lea.vmem %s1098_s0, %s782_s14  ;;  %713 = vmatpush1.bf16.msra.mxu0 %v712_v18  ;;  %687 = vmatprep.subr.bf16.mxu1 %v800_v3  ;;  %v703_v60 = vpack.c.bf16 %v651_v55, %v650_v53  ;;  %v730_v0 = vpack.c.bf16 %v206_v59, %v205_v58  ;;  %v656_v1 = vld [vmem:[%s1099_s1 + $0x120] sm:$0xff]  ;;  %v657_v2 = vld [vmem:[%s1099_s1 + $0x128] sm:$0xff]  ;;  %v658_v9 = vld [vmem:[%s1099_s1 + $0x130] sm:$0xff]  ;;  %s182_s14 = scalar_lea.vmem %s1101_s3, %s633_s13 }
  0x12   : > { %v903_v27 = vld [vmem:[%s893_s25 + $0x8] sm:$0xff]  ;;  %v906_v28 = vld [vmem:[%s893_s25 + $0x18] sm:$0xff]  ;;  %714 = vmatprep.subr.bf16.mxu0 %v800_v3  ;;  %v973_v56 = vld [vmem:[%s893_s25] sm:$0xff]  ;;  %v733_v7 = vpack.c.bf16 %v657_v2, %v656_v1 }
  0x13   : > { %v236_v31 = vrot.slane %v903_v27, 1  ;;  %v237_v32 = vrot.slane %v906_v28, 1  ;;  %654 = vmatprep.mubr.msk.f32.mxu0 %vm245_vm0, %v903_v27  ;;  %v976_v57 = vld [vmem:[%s893_s25 + $0x10] sm:$0xff]  ;;  %v233_v61 = vrot.slane %v973_v56, 1  ;;  %v188_v63 = vld [vmem:[%s893_s25 + $0x28] sm:$0x3] }
  0x14   : > { %689 = vmatpush1.bf16.msra.mxu1 %v688_v23  ;;  %v234_v62 = vrot.slane %v976_v57, 1  ;;  %v996_v4 = vld [vmem:[%s893_s25 + $0x20] sm:$0x3]  ;;  %v241_v5 = vrot.slane %v188_v63, 1  ;;  %v659_v10 = vld [vmem:[%s1099_s1 + $0x138] sm:$0xff]  ;;  %v427_v12 = vrot.slane %v903_v27, 2 }
  0x15   : > { %v238_v34 = vsel %vm232_vm1, %v236_v31, %v237_v32  ;;  %716 = vmatpush1.bf16.msra.mxu0 %v715_v25  ;;  %690 = vmatprep.subr.bf16.mxu1 %v800_v3  ;;  %v239_v8 = vrot.slane %v996_v4, 1  ;;  %v428_v13 = vrot.slane %v906_v28, 2  ;;  %v736_v14 = vpack.c.bf16 %v659_v10, %v658_v9  ;;  %v660_v17 = vld [vmem:[%s1099_s1 + $0x140] sm:$0xff]  ;;  %v661_v18 = vld [vmem:[%s1099_s1 + $0x148] sm:$0xff]  ;;  %v662_v22 = vld [vmem:[%s1099_s1 + $0x150] sm:$0xff] }
  0x16   : > { %717 = vmatprep.subr.bf16.mxu0 %v800_v3  ;;  %652 = vmatprep.mubr.msk.f32.mxu1 %vm245_vm0, %v238_v34  ;;  %v235_v6 = vsel %vm232_vm1, %v233_v61, %v234_v62  ;;  %v242_v11 = vsel %vm232_vm1, %v237_v32, %v241_v5  ;;  %v432_v16 = vrot.slane %v188_v63, 2  ;;  %v739_v20 = vpack.c.bf16 %v661_v18, %v660_v17  ;;  %v663_v23 = vld [vmem:[%s1099_s1 + $0x158] sm:$0xff]  ;;  %v664_v25 = vld [vmem:[%s1099_s1 + $0x160] sm:$0xff]  ;;  %v665_v26 = vld [vmem:[%s1099_s1 + $0x168] sm:$0xff] }
  0x17   : > { %v240_v15 = vsel %vm232_vm1, %v234_v62, %v239_v8  ;;  %v429_v19 = vsel %vm423_vm2, %v427_v12, %v428_v13  ;;  %v742_v24 = vpack.c.bf16 %v663_v23, %v662_v22  ;;  %v745_v27 = vpack.c.bf16 %v665_v26, %v664_v25  ;;  %v667_v29 = vld [vmem:[%s1099_s1 + $0x178] sm:$0xff]  ;;  %v668_v31 = vld [vmem:[%s1099_s1 + $0x180] sm:$0xff]  ;;  %v669_v32 = vld [vmem:[%s1099_s1 + $0x188] sm:$0xff] }
  0x18   : > { %692 = vmatpush1.bf16.msra.mxu1 %v691_v33  ;;  %v433_v21 = vsel %vm423_vm2, %v428_v13, %v432_v16  ;;  %v751_v33 = vpack.c.bf16 %v669_v32, %v668_v31  ;;  %v670_v34 = vld [vmem:[%s1099_s1 + $0x190] sm:$0xff]  ;;  %v672_v37 = vld [vmem:[%s1099_s1 + $0x1a0] sm:$0xff]  ;;  %v673_v38 = vld [vmem:[%s1099_s1 + $0x1a8] sm:$0xff]  ;;  %v430_v39 = vrot.slane %v996_v4, 2  ;;  %v424_v42 = vrot.slane %v973_v56, 2 }
  0x19   : > { %719 = vmatpush1.bf16.msra.mxu0 %v718_v35  ;;  %693 = vmatprep.subr.bf16.mxu1 %v800_v3  ;;  %v671_v35 = vld [vmem:[%s1099_s1 + $0x198] sm:$0xff] }
  0x1a   : > { %720 = vmatprep.subr.bf16.mxu0 %v800_v3  ;;  %v754_v36 = vpack.c.bf16 %v671_v35, %v670_v34 }
  0x1c   : > { %695 = vmatpush1.bf16.msra.mxu1 %v694_v40  ;;  %v757_v40 = vpack.c.bf16 %v673_v38, %v672_v37 }
  0x1d   : > { %722 = vmatpush1.bf16.msra.mxu0 %v721_v41  ;;  %696 = vmatprep.subr.bf16.mxu1 %v800_v3  ;;  %v425_v41 = vrot.slane %v976_v57, 2 }
  0x1e   : > { %723 = vmatprep.subr.bf16.mxu0 %v800_v3 }
  0x1f   : > { %v431_v43 = vsel %vm423_vm2, %v425_v41, %v430_v39  ;;  %v426_v44 = vsel %vm423_vm2, %v424_v42, %v425_v41 }
  0x20   : > { %698 = vmatpush1.bf16.msra.mxu1 %v697_v46 }
  0x21   : > { %725 = vmatpush1.bf16.msra.mxu0 %v724_v47  ;;  %699 = vmatprep.subr.bf16.mxu1 %v800_v3 }
  0x22   : > { %726 = vmatprep.subr.bf16.mxu0 %v800_v3 }
  0x24   : > { %701 = vmatpush1.bf16.msra.mxu1 %v700_v52 }
  0x25   : > { %728 = vmatpush1.bf16.msra.mxu0 %v727_v54  ;;  %702 = vmatprep.subr.bf16.mxu1 %v800_v3 }
  0x26   : > { %729 = vmatprep.subr.bf16.mxu0 %v800_v3 }
  0x28   : > { %704 = vmatpush1.bf16.msra.mxu1 %v703_v60 }
  0x29   : > { %731 = vmatpush1.bf16.msra.mxu0 %v730_v0  ;;  %759 = vmatprep.subr.bf16.mxu1 %v800_v3 }
  0x2a   : > { %732 = vmatprep.subr.bf16.mxu0 %v800_v3 }
  0x2b   : > { %315 = vmatmul.mubr.f32.vlgmr.msra.gmra.mrb[0].mxu1 %v235_v6 }
  0x2c   : > { %394 = vmatmul.mubr.f32.vlgmr.msra.gmra.mrb[0].mxu0 %v973_v56  ;;  %768 = vmatpush1.bf16.msra.mxu1 %v733_v7 }
  0x2d   : > { %734 = vmatpush1.bf16.msra.mxu0 %v733_v7  ;;  %760 = vmatprep.subr.bf16.mxu1 %v800_v3 }
  0x2e   : > { %735 = vmatprep.subr.bf16.mxu0 %v800_v3  ;;  %653 = vmatprep.mubr.msk.f32.mxu1 %vm245_vm0, %v242_v11 }
  0x2f   : > { %655 = vmatprep.mubr.msk.f32.mxu0 %vm245_vm0, %v906_v28  ;;  %320 = vmatmul.mubr.f32.gmra.mrb[2].mxu1 %v240_v15  ;;  %v666_v28 = vld [vmem:[%s1099_s1 + $0x170] sm:$0xff] }
  0x30   : > { %769 = vmatpush1.bf16.msra.mxu1 %v736_v14  ;;  %399 = vmatmul.mubr.f32.gmra.mrb[2].mxu0 %v976_v57  ;;  %v748_v30 = vpack.c.bf16 %v667_v29, %v666_v28 }
  0x31   : > { %737 = vmatpush1.bf16.msra.mxu0 %v736_v14  ;;  %761 = vmatprep.subr.bf16.mxu1 %v800_v3 }
  0x32   : > { %738 = vmatprep.subr.bf16.mxu0 %v800_v3  ;;  %674 = vmatprep.mubr.msk.f32.mxu0 %vm245_vm0, %v429_v19 }
  0x33   : > { %675 = vmatprep.mubr.msk.f32.mxu1 %vm245_vm0, %v433_v21 }
  0x34   : > { %770 = vmatpush1.bf16.msra.mxu1 %v739_v20 }
  0x35   : > { %740 = vmatpush1.bf16.msra.mxu0 %v739_v20  ;;  %762 = vmatprep.subr.bf16.mxu1 %v800_v3 }
  0x36   : > { %741 = vmatprep.subr.bf16.mxu0 %v800_v3 }
  0x38   : > { %771 = vmatpush1.bf16.msra.mxu1 %v742_v24 }
  0x39   : > { %743 = vmatpush1.bf16.msra.mxu0 %v742_v24  ;;  %763 = vmatprep.subr.bf16.mxu1 %v800_v3 }
  0x3a   : > { %744 = vmatprep.subr.bf16.mxu0 %v800_v3 }
  0x3c   : > { %772 = vmatpush1.bf16.msra.mxu1 %v745_v27 }
  0x3d   : > { %746 = vmatpush1.bf16.msra.mxu0 %v745_v27  ;;  %764 = vmatprep.subr.bf16.mxu1 %v800_v3 }
  0x3e   : > { %747 = vmatprep.subr.bf16.mxu0 %v800_v3 }
  0x40   : > { %773 = vmatpush1.bf16.msra.mxu1 %v748_v30 }
  0x41   : > { %749 = vmatpush1.bf16.msra.mxu0 %v748_v30  ;;  %765 = vmatprep.subr.bf16.mxu1 %v800_v3 }
  0x42   : > { %750 = vmatprep.subr.bf16.mxu0 %v800_v3 }
  0x44   : > { %774 = vmatpush1.bf16.msra.mxu1 %v751_v33 }
  0x45   : > { %752 = vmatpush1.bf16.msra.mxu0 %v751_v33  ;;  %766 = vmatprep.subr.bf16.mxu1 %v800_v3 }
  0x46   : > { %753 = vmatprep.subr.bf16.mxu0 %v800_v3 }
  0x48   : > { %775 = vmatpush1.bf16.msra.mxu1 %v754_v36 }
  0x49   : > { %755 = vmatpush1.bf16.msra.mxu0 %v754_v36  ;;  %767 = vmatprep.subr.bf16.mxu1 %v800_v3 }
  0x4a   : > { %756 = vmatprep.subr.bf16.mxu0 %v800_v3 }
  0x4c   : > { %776 = vmatpush1.bf16.msra.mxu1 %v757_v40 }
  0x4d   : > { %758 = vmatpush1.bf16.msra.mxu0 %v757_v40 }
  0x4f   : > { %510 = vmatmul.mubr.f32.vlgmr.msra.gmra.mrb[4].mxu1 %v431_v43 }
  0x50   : > { %505 = vmatmul.mubr.f32.vlgmr.msra.gmra.mrb[0].mxu0 %v426_v44 }
  0xfe   : > { %v316_v45 = vpop.f32.mrb[0].mxu1 }
  0xff   : > { %v318_v46 = vpop.f32.mrb[1].mxu1 }
 0x102   : > { %v321_v47 = vpop.f32.mrb[2].mxu1 }
 0x103   : > { %v400_v48 = vpop.f32.mrb[2].mxu0  ;;  %v323_v49 = vpop.f32.mrb[3].mxu1 }
 0x104   : > { %v401_v50 = vadd.f32 %v400_v48, %v321_v47  ;;  %v402_v51 = vpop.f32.mrb[3].mxu0 }
 0x122   : > { %v511_v3 = vpop.f32.mrb[4].mxu1 }
 0x123   : > { %v506_v52 = vpop.f32.mrb[0].mxu0  ;;  %v516_v53 = vadd.f32 %v511_v3, %v401_v50  ;;  %v513_v54 = vpop.f32.mrb[5].mxu1 }
 0x124   : > { %v777_v55 = vadd.f32 %v506_v52, %v316_v45  ;;  %v508_v56 = vpop.f32.mrb[1].mxu0 }
 0x125   : > { %v527_v57 = vmul.f32 %v516_v53, %v516_v53  ;;  %518 = vst [vmem:[%s177_s9 + $0x8] sm:$0xff] %v516_v53 }
 0x126   : > { %517 = vst [vmem:[%s177_s9] sm:$0xff] %v777_v55  ;;  %v526_v58 = vmul.f32 %v777_v55, %v777_v55  ;;  %v519_v59 = vadd.f32 %v777_v55, %v516_v53 }
 0x128   : > { %v520_v60 = vrot.slane %v519_v59, 4  ;;  %v528_v61 = vadd.f32 %v527_v57, %v526_v58 }
 0x12a   : > { %v521_v62 = vadd.f32 %v520_v60, %v519_v59  ;;  %v529_v63 = vrot.slane %v528_v61, 4 }
 0x12c   : > { %v522_v0 = vrot.slane %v521_v62, 2  ;;  %v530_v1 = vadd.f32 %v529_v63, %v528_v61 }
 0x12e   : > { %v523_v2 = vadd.f32 %v522_v0, %v521_v62  ;;  %v531_v4 = vrot.slane %v530_v1, 2 }
 0x130   : > { %v524_v5 = vrot.slane %v523_v2, 1  ;;  %v532_v6 = vadd.f32 %v531_v4, %v530_v1 }
 0x132   : > { %v533_v7 = vrot.slane %v532_v6, 1  ;;  %v525_v8 = vadd.f32 %v524_v5, %v523_v2 }
 0x134   : > { %v534_v9 = vadd.f32 %v533_v7, %v532_v6 }
 0x136   : > { %v536_v10 = vsel %vm535_vm3, %v525_v8, %v534_v9 }
 0x137   : > { %537 = vst [vmem:[%s182_s14] sm:$0x3] %v536_v10 }
 0x138 PF: > { %s14_s12 = sadd.s32 1, %s798_s12  }
 0x139   : > { %p11_p5 = scmp.ge.s32.totalorder %s14_s12, 4  }
 0x13b   :  { %13 = sbr.rel (!%p11_p5) target bundleno = 1 (0x1), region = 72 }

// kernel: encoder_forward.7
= control target key start
LH: loop header
LB: loop body
LE: loop exit
PB: predicated region body
PF: predicated region fallthrough
CT: control target
= control target key end

     0   :  { %s542_s15 = smov 0   ;;  %s704_s0 = inlined_call_operand.vmem [shape: f32[16,2,8,16], index: 0, kind: input, shape index: {}]   ;;  %s705_s1 = inlined_call_operand.vmem [shape: f32[1,16], index: 1, kind: input, shape index: {}]   ;;  %s706_s2 = inlined_call_operand.vmem [shape: f32[1,16], index: 2, kind: input, shape index: {}]   ;;  %s707_s3 = inlined_call_operand.vmem [shape: f32[16,2,8,16], index: 3, kind: output, shape index: {0}]   ;;  %s708_s4 = inlined_call_operand.vmem [shape: f32[16,8,8], index: 4, kind: output, shape index: {1}]  }
   0x1 LB: > { %s480_s16 = sadd.s32 4294967295, %s514_s15   ;;  %p484_p0 = scmp.ge.s32.totalorder %s514_s15, 1  ;;  %s514_s15 = sphi %s542_s15, %s15_s15  }
   0x2   : > { %p167_p1 = scmp.lt.s32.totalorder %s514_s15, 3 }
   0x4   : > { %p168_p2 = pnand %p484_p0, %p167_p1 }
   0x5   : > { %s485_s17 = sshll.u32 (!%p168_p2), %s480_s16, 3  ;;  %v556_v0 = vld [vmem:[%s705_s1] ss:$0 sm:$0xff] (!%p168_p2)  ;;  %vm298_vm0 = vcmask (!%p168_p2), 130048   ;;  %s516_s29 = smov (!%p168_p2), 120   ;;  %vm379_vm1 = vcmask (!%p168_p2), 64512  }
   0x6   : > { %171 = sbr.rel (%p168_p2) target bundleno = 158 (0x9e), region = 32  ;;  %p201_p3 = scmp.lt.s32.totalorder (!%p168_p2), %s485_s17, 15  ;;  %v566_v1 = vld [vmem:[%s706_s2] ss:$0 sm:$0xff] (!%p168_p2) }
   0xd   : > { %s710_s17 = smov (!%p201_p3, %s485_s17), 15 }
   0xe   : > { %s497_s18 = sshll.u32 %s710_s17, 4  ;;  %s492_s30 = sshll.u32 %s710_s17, 3 }
   0xf   : > { %s561_s23 = scalar_lea.vmem %s704_s0, %s497_s18  ;;  %s589_s28 = scalar_lea.vmem %s707_s3, %s497_s18 }
  0x10   : > { %v224_v2 = vld [vmem:[%s561_s23 + $0x20] sm:$0xff]  ;;  %v225_v3 = vld [vmem:[%s561_s23 + $0x28] sm:$0xff]  ;;  %v226_v9 = vld [vmem:[%s561_s23 + $0x30] sm:$0xff]  ;;  %s218_s7 = scalar_lea.vmem %s708_s4, %s492_s30 }
  0x11   : > { %v220_v4 = vld [vmem:[%s561_s23] sm:$0xff]  ;;  %v247_v5 = vmul.f32 %v556_v0, %v224_v2  ;;  %v248_v6 = vmul.f32 %v556_v0, %v225_v3  ;;  %v221_v7 = vld [vmem:[%s561_s23 + $0x8] sm:$0xff]  ;;  %v227_v10 = vld [vmem:[%s561_s23 + $0x38] sm:$0xff]  ;;  %v249_v12 = vmul.f32 %v556_v0, %v226_v9 }
  0x12   : > { %v243_v8 = vmul.f32 %v556_v0, %v220_v4  ;;  %v244_v11 = vmul.f32 %v556_v0, %v221_v7  ;;  %v250_v13 = vmul.f32 %v556_v0, %v227_v10  ;;  %v222_v14 = vld [vmem:[%s561_s23 + $0x10] sm:$0xff]  ;;  %v223_v15 = vld [vmem:[%s561_s23 + $0x18] sm:$0xff]  ;;  %v228_v38 = vld [vmem:[%s561_s23 + $0x40] sm:$0xff] }
  0x13   : > { %v270_v16 = vadd.f32 %v566_v1, %v247_v5  ;;  %v271_v17 = vadd.f32 %v566_v1, %v248_v6  ;;  %v245_v19 = vmul.f32 %v556_v0, %v222_v14  ;;  %v272_v21 = vadd.f32 %v566_v1, %v249_v12  ;;  %v230_v32 = vld [vmem:[%s561_s23 + $0x50] sm:$0xff]  ;;  %v231_v33 = vld [vmem:[%s561_s23 + $0x58] sm:$0xff]  ;;  %v229_v39 = vld [vmem:[%s561_s23 + $0x48] sm:$0xff] }
  0x14   : > { %v266_v18 = vadd.f32 %v566_v1, %v243_v8  ;;  %v267_v20 = vadd.f32 %v566_v1, %v244_v11  ;;  %v273_v22 = vadd.f32 %v566_v1, %v250_v13  ;;  %v246_v23 = vmul.f32 %v556_v0, %v223_v15  ;;  %v234_v44 = vld [vmem:[%s561_s23 + $0x70] sm:$0xff]  ;;  %v235_v45 = vld [vmem:[%s561_s23 + $0x78] sm:$0xff]  ;;  %v232_v46 = vld [vmem:[%s561_s23 + $0x60] sm:$0xff] }
  0x15   : > { %v286_v24 = vmax.f32 %v270_v16, 0.0  ;;  %v287_v25 = vmax.f32 %v271_v17, 0.0  ;;  %v268_v27 = vadd.f32 %v566_v1, %v245_v19  ;;  %v288_v29 = vmax.f32 %v272_v21, 0.0  ;;  %v233_v55 = vld [vmem:[%s561_s23 + $0x68] sm:$0xff] }
  0x16   : > { %v282_v26 = vmax.f32 %v266_v18, 0.0  ;;  %v283_v28 = vmax.f32 %v267_v20, 0.0  ;;  %v289_v30 = vmax.f32 %v273_v22, 0.0  ;;  %v269_v31 = vadd.f32 %v566_v1, %v246_v23 }
  0x17   : > { %304 = vst.msk [vmem:[%s589_s28 + $0x28] sm:$0xff] %vm298_vm0, %v287_v25  ;;  %v321_v34 = vsel %vm298_vm0, %v286_v24, -inf  ;;  %v322_v35 = vsel %vm298_vm0, %v287_v25, -inf  ;;  %303 = vst.msk [vmem:[%s589_s28 + $0x20] sm:$0xff] %vm298_vm0, %v286_v24  ;;  %v284_v37 = vmax.f32 %v268_v27, 0.0  ;;  %v324_v42 = vsel %vm298_vm0, %v288_v29, -inf }
  0x18   : > { %v315_v36 = vsel %vm298_vm0, %v282_v26, -inf  ;;  %299 = vst.msk [vmem:[%s589_s28] sm:$0xff] %vm298_vm0, %v282_v26  ;;  %v610_v40 = vmax.f32 %v321_v34, %v322_v35  ;;  %300 = vst.msk [vmem:[%s589_s28 + $0x8] sm:$0xff] %vm298_vm0, %v283_v28  ;;  %v316_v41 = vsel %vm298_vm0, %v283_v28, -inf  ;;  %v325_v43 = vsel %vm298_vm0, %v289_v30, -inf }
  0x19   : > { %305 = vst.msk [vmem:[%s589_s28 + $0x30] sm:$0xff] %vm298_vm0, %v288_v29  ;;  %306 = vst.msk [vmem:[%s589_s28 + $0x38] sm:$0xff] %vm298_vm0, %v289_v30  ;;  %v624_v47 = vmax.f32 %v315_v36, %v316_v41  ;;  %v626_v48 = vmax.f32 %v324_v42, %v325_v43  ;;  %v285_v49 = vmax.f32 %v269_v31, 0.0  ;;  %v318_v50 = vsel %vm298_vm0, %v284_v37, -inf }
  0x1a   : > { %301 = vst.msk [vmem:[%s589_s28 + $0x10] sm:$0xff] %vm298_vm0, %v284_v37  ;;  %351 = vrot.lane.b32.xlu1 %v610_v40, %s516_s29  ;;  %v253_v51 = vmul.f32 %v556_v0, %v230_v32  ;;  %v254_v52 = vmul.f32 %v556_v0, %v231_v33  ;;  %v251_v53 = vmul.f32 %v556_v0, %v228_v38 }
  0x1b   : > { %v252_v54 = vmul.f32 %v556_v0, %v229_v39  ;;  %347 = vrot.lane.b32.xlu0 %v624_v47, %s516_s29  ;;  %302 = vst.msk [vmem:[%s589_s28 + $0x18] sm:$0xff] %vm298_vm0, %v285_v49  ;;  %v319_v56 = vsel %vm298_vm0, %v285_v49, -inf  ;;  %v257_v57 = vmul.f32 %v556_v0, %v234_v44  ;;  %v258_v58 = vmul.f32 %v556_v0, %v235_v45 }
  0x1c   : > { %v255_v59 = vmul.f32 %v556_v0, %v232_v46  ;;  %v320_v60 = vmax.f32 %v318_v50, %v319_v56  ;;  %v276_v61 = vadd.f32 %v566_v1, %v253_v51  ;;  %v277_v62 = vadd.f32 %v566_v1, %v254_v52 }
  0x1d   : > { %v274_v63 = vadd.f32 %v566_v1, %v251_v53  ;;  %v275_v2 = vadd.f32 %v566_v1, %v252_v54  ;;  %v280_v3 = vadd.f32 %v566_v1, %v257_v57  ;;  %v281_v4 = vadd.f32 %v566_v1, %v258_v58 }
  0x1e   : > { %v256_v5 = vmul.f32 %v556_v0, %v233_v55  ;;  %353 = vrot.lane.b32.xlu1 %v626_v48, %s516_s29  ;;  %v292_v6 = vmax.f32 %v276_v61, 0.0  ;;  %v293_v7 = vmax.f32 %v277_v62, 0.0  ;;  %v278_v9 = vadd.f32 %v566_v1, %v255_v59 }
  0x1f   : > { %v290_v8 = vmax.f32 %v274_v63, 0.0  ;;  %349 = vrot.lane.b32.xlu0 %v320_v60, %s516_s29  ;;  %v291_v10 = vmax.f32 %v275_v2, 0.0  ;;  %v296_v11 = vmax.f32 %v280_v3, 0.0  ;;  %v297_v12 = vmax.f32 %v281_v4, 0.0 }
  0x20   : > { %v279_v13 = vadd.f32 %v566_v1, %v256_v5  ;;  %309 = vst.msk [vmem:[%s589_s28 + $0x50] sm:$0xff] %vm298_vm0, %v292_v6  ;;  %310 = vst.msk [vmem:[%s589_s28 + $0x58] sm:$0xff] %vm298_vm0, %v293_v7  ;;  %v330_v0 = vsel %vm298_vm0, %v292_v6, -inf  ;;  %v331_v14 = vsel %vm298_vm0, %v293_v7, -inf  ;;  %v294_v16 = vmax.f32 %v278_v9, 0.0 }
  0x21   : > { %307 = vst.msk [vmem:[%s589_s28 + $0x40] sm:$0xff] %vm298_vm0, %v290_v8  ;;  %v327_v15 = vsel %vm298_vm0, %v290_v8, -inf  ;;  %v332_v17 = vmax.f32 %v330_v0, %v331_v14  ;;  %308 = vst.msk [vmem:[%s589_s28 + $0x48] sm:$0xff] %vm298_vm0, %v291_v10  ;;  %v328_v1 = vsel %vm298_vm0, %v291_v10, -inf  ;;  %v336_v18 = vsel %vm298_vm0, %v296_v11, -inf }
  0x22   : > { %313 = vst.msk [vmem:[%s589_s28 + $0x70] sm:$0xff] %vm298_vm0, %v296_v11  ;;  %314 = vst.msk [vmem:[%s589_s28 + $0x78] sm:$0xff] %vm298_vm0, %v297_v12  ;;  %v337_v19 = vsel %vm298_vm0, %v297_v12, -inf  ;;  %v329_v20 = vmax.f32 %v327_v15, %v328_v1  ;;  %v295_v21 = vmax.f32 %v279_v13, 0.0  ;;  %v333_v22 = vsel %vm298_vm0, %v294_v16, -inf }
  0x23   : > { %311 = vst.msk [vmem:[%s589_s28 + $0x60] sm:$0xff] %vm298_vm0, %v294_v16  ;;  %357 = vrot.lane.b32.xlu1 %v332_v17, %s516_s29  ;;  %v338_v23 = vmax.f32 %v336_v18, %v337_v19 }
  0x24   : > { %355 = vrot.lane.b32.xlu0 %v329_v20, %s516_s29  ;;  %312 = vst.msk [vmem:[%s589_s28 + $0x68] sm:$0xff] %vm298_vm0, %v295_v21  ;;  %v334_v24 = vsel %vm298_vm0, %v295_v21, -inf }
  0x25   : > { %v335_v25 = vmax.f32 %v333_v22, %v334_v24 }
  0x27   : > { %361 = vrot.lane.b32.xlu1 %v338_v23, %s516_s29 }
  0x28   : > { %359 = vrot.lane.b32.xlu0 %v335_v25, %s516_s29 }
  0x8c   : > { %v352_v26 = vpop.permute.xlu1 %351 }
  0x8d   : > { %v373_v27 = vmax.f32 %v610_v40, %v352_v26  ;;  %v348_v28 = vpop.permute.xlu0 %347 }
  0x8e   : > { %v371_v29 = vmax.f32 %v624_v47, %v348_v28 }
  0x8f   : > { %382 = vst.msk [vmem:[%s218_s7 + $0x10] sm:$0xff] %vm379_vm1, %v373_v27 }
  0x90   : > { %380 = vst.msk [vmem:[%s218_s7] sm:$0xff] %vm379_vm1, %v371_v29  ;;  %v354_v30 = vpop.permute.xlu1 %353 }
  0x91   : > { %v374_v31 = vmax.f32 %v626_v48, %v354_v30  ;;  %v350_v32 = vpop.permute.xlu0 %349 }
  0x92   : > { %v372_v33 = vmax.f32 %v320_v60, %v350_v32 }
  0x93   : > { %383 = vst.msk [vmem:[%s218_s7 + $0x18] sm:$0xff] %vm379_vm1, %v374_v31 }
  0x94   : > { %381 = vst.msk [vmem:[%s218_s7 + $0x8] sm:$0xff] %vm379_vm1, %v372_v33 }
  0x95   : > { %v358_v34 = vpop.permute.xlu1 %357 }
  0x96   : > { %v376_v35 = vmax.f32 %v332_v17, %v358_v34  ;;  %v356_v36 = vpop.permute.xlu0 %355 }
  0x97   : > { %v375_v37 = vmax.f32 %v329_v20, %v356_v36 }
  0x98   : > { %385 = vst.msk [vmem:[%s218_s7 + $0x28] sm:$0xff] %vm379_vm1, %v376_v35 }
  0x99   : > { %384 = vst.msk [vmem:[%s218_s7 + $0x20] sm:$0xff] %vm379_vm1, %v375_v37  ;;  %v362_v38 = vpop.permute.xlu1 %361 }
  0x9a   : > { %v378_v39 = vmax.f32 %v338_v23, %v362_v38  ;;  %v360_v40 = vpop.permute.xlu0 %359 }
  0x9b   : > { %v377_v41 = vmax.f32 %v335_v25, %v360_v40 }
  0x9c   : > { %387 = vst.msk [vmem:[%s218_s7 + $0x38] sm:$0xff] %vm379_vm1, %v378_v39 }
  0x9d   : > { %386 = vst.msk [vmem:[%s218_s7 + $0x30] sm:$0xff] %vm379_vm1, %v377_v41 }
  0x9e PF: > { %s15_s15 = sadd.s32 1, %s514_s15  }
  0x9f   : > { %p12_p4 = scmp.ge.s32.totalorder %s15_s15, 4  }
  0xa1   :  { %14 = sbr.rel (!%p12_p4) target bundleno = 1 (0x1), region = 74 }

</bundles_post_ra>
